<compile_context>
chip_gen: v7x
topology: tpu7x:2x2x1
jax: 0.10.0
libtpu: 0.0.40
codegen_flags: <defaults>
</compile_context>

<pallas_src>
import jax
import jax.numpy as jnp
from jax import lax
from jax.experimental import pallas as pl
from jax.experimental.pallas import tpu as pltpu

N_BATCH = 2
IN_HW = 28   # 28x28 single-channel input => 16*5*5 = 400 features at fc1


def _lenet_kernel(x4_ref,               # (4, nb*8, 32)  height-decimated padded images
                  w1_ref, b1_ref,       # (5, 32, 212),  (1, 84)
                  w2_ref, b2_ref,       # (5, 84, 208),  (1, 80)
                  fc1w_ref, fc1b_ref,   # (400, 120),    (1, 120)
                  fc2w_ref, fc2b_ref,   # (120, 84),     (1, 84)
                  fc3w_ref, fc3b_ref,   # (84, 10),      (1, 10)
                  sel_ref,              # (nb, nb*8-4)   one-hot fc-row selector
                  out_ref,              # (nb, 10)
                  p1a_ref, p1b_ref,     # scratch (nb*8, 84): pool1 even/odd pooled rows
                  z_ref):               # scratch (nb*8, 80): pool2 output
    f32 = jnp.float32
    nb = out_ref.shape[0]
    R = nb * 8            # rows per 8-row-per-image slot buffer
    L1 = R - 1            # conv1 window length (valid pooled rows: u = i2//2 <= 6)
    L2 = R - 2            # conv2 window length (valid pooled rows: pi <= 4)
    L3 = R - 4            # fc1 slot rows (only rows n*8 carry real images)

    # Filler rows (u==7, pi>=5, non-n*8 fc rows) are never *selected*
    # downstream, but they are multiplied by exact 0.0 in the final selection
    # matmul, so they must stay finite: zero the scratch tails that are read
    # but not rewritten this grid step (cheap, a few vreg stores).
    p1a_ref[...] = jnp.zeros((R, 84), f32)
    p1b_ref[...] = jnp.zeros((R, 84), f32)
    z_ref[...] = jnp.zeros((R, 80), f32)

    # ---- conv1 (5x5, pad=2) + bias + relu + 2x2 maxpool ----------------------
    # q = pooled-row parity, di/dj = pool phases, ki = kernel row tap.
    # Padded-image row 4u + (2q+di+ki) lives in decimated buffer (2q+di+ki)%4
    # at row u + (2q+di+ki)//4, so every tap is a contiguous sublane window of
    # x4.  The two dj phases live in weight columns [0:84) and [128:212)
    # (vreg-aligned), so the width pool is an aligned lane-half max.
    for q, p1_ref in ((0, p1a_ref), (1, p1b_ref)):
        best = None
        for di in (0, 1):
            acc = None
            for ki in range(5):
                e = 2 * q + di + ki
                lhs = x4_ref[e % 4, e // 4: e // 4 + L1, :]
                d = jnp.dot(lhs, w1_ref[ki], preferred_element_type=f32)
                acc = d if acc is None else acc + d
            m = jnp.maximum(acc[:, 0:84], acc[:, 128:212])       # width pool (dj)
            best = m if best is None else jnp.maximum(best, m)   # height pool (di)
        p1_ref[0:L1, :] = jnp.maximum(best + b1_ref[...], 0.0)   # rows (n,u), lanes (j2,c)

    # ---- conv2 (5x5, valid) + bias + relu + 2x2 maxpool ----------------------
    # Same trick one level up: pool1 row 2*pi + ei + ki lives in parity buffer
    # (ei+ki)%2 at row pi + (ei+ki)//2; the ej pool phase sits in weight
    # columns [0:80) / [128:208).
    p1 = (p1a_ref, p1b_ref)
    best2 = None
    for ei in (0, 1):
        acc = None
        for ki in range(5):
            e = ei + ki
            lhs = p1[e % 2][e // 2: e // 2 + L2, :]
            d = jnp.dot(lhs, w2_ref[ki], preferred_element_type=f32)
            acc = d if acc is None else acc + d
        m = jnp.maximum(acc[:, 0:80], acc[:, 128:208])
        best2 = m if best2 is None else jnp.maximum(best2, m)
    z_ref[0:L2, :] = jnp.maximum(best2 + b2_ref[...], 0.0)       # rows (n,pi), lanes (pj,co)

    # ---- flatten + fc1: 5 row-shifted slot matmuls (K=80 each) ---------------
    # h[n*8] = sum_s z[n*8+s] @ fc1w[80s:80s+80]  ==  fc1(flatten(z_n));
    # the remaining rows are harmless finite filler.
    h = None
    for s in range(5):
        d = jnp.dot(z_ref[s: s + L3, :], fc1w_ref[80 * s: 80 * s + 80, :],
                    preferred_element_type=f32)
        h = d if h is None else h + d

    # One-hot selection matmul extracts rows n*8 (no strided row gather).
    hsel = jnp.dot(sel_ref[...], h, preferred_element_type=f32)          # (nb, 120)
    h1 = jnp.maximum(hsel + fc1b_ref[...], 0.0)
    h2 = jnp.maximum(jnp.dot(h1, fc2w_ref[...], preferred_element_type=f32)
                     + fc2b_ref[...], 0.0)
    logits = jnp.dot(h2, fc3w_ref[...], preferred_element_type=f32) + fc3b_ref[...]
    out_ref[...] = logits.astype(out_ref.dtype)


def _pack_conv1(w, b):
    """conv1 weights -> per-kernel-row width-Toeplitz matrices.

    W1[ki][j_in, j2*6 + c]       = w[c, 0, ki, j_in - 2*j2]      (pool phase dj=0)
    W1[ki][j_in, 128 + j2*6 + c] = w[c, 0, ki, j_in - 2*j2 - 1]  (pool phase dj=1)
    (zero outside the 5-tap band); bias tiled to (1, 84) over (j2, c).
    """
    w = w[:, 0].astype(jnp.float32)                              # (c, ki, kj)
    J2, KJ, C = jnp.meshgrid(jnp.arange(14), jnp.arange(5), jnp.arange(6),
                             indexing="ij")
    cols = J2 * 6 + C
    mats = []
    for ki in range(5):
        vals = w[C, ki, KJ]
        m = jnp.zeros((32, 212), jnp.float32)
        for dj in (0, 1):
            m = m.at[2 * J2 + dj + KJ, cols + 128 * dj].set(vals)
        mats.append(m)
    return jnp.stack(mats), jnp.tile(b.reshape(1, 6).astype(jnp.float32), (1, 14))


def _pack_conv2(w, b):
    """conv2 weights -> per-kernel-row width-Toeplitz matrices.

    W2[ki][j2*6 + c, pj*16 + co]       = w[co, c, ki, j2 - 2*pj]      (ej=0)
    W2[ki][j2*6 + c, 128 + pj*16 + co] = w[co, c, ki, j2 - 2*pj - 1]  (ej=1)
    bias tiled to (1, 80) over (pj, co).
    """
    w = w.astype(jnp.float32)                                     # (co, c, ki, kj)
    PJ, KJ, C, CO = jnp.meshgrid(jnp.arange(5), jnp.arange(5), jnp.arange(6),
                                 jnp.arange(16), indexing="ij")
    cols = PJ * 16 + CO
    mats = []
    for ki in range(5):
        vals = w[CO, C, ki, KJ]
        m = jnp.zeros((84, 208), jnp.float32)
        for ej in (0, 1):
            m = m.at[(2 * PJ + ej + KJ) * 6 + C, cols + 128 * ej].set(vals)
        mats.append(m)
    return jnp.stack(mats), jnp.tile(b.reshape(1, 16).astype(jnp.float32), (1, 5))


def lenet_forward(x_nchw, params, *, batch_block=None):
    """PyTorch-semantics LeNet forward.  x_nchw: (N, 1, 28, 28) float32."""
    n = x_nchw.shape[0]
    if batch_block is not None:
        nb = batch_block
    elif n <= 8:
        nb = n                        # single block for tiny batches
    elif n % 8 == 0:
        nb = 8                        # >=2 grid steps: pipelining + megacore split
    else:
        nb = n
    assert n % nb == 0, "batch must be divisible by the batch block"
    f32 = jnp.float32
    R = nb * 8

    # Host-side layout plumbing only: zero-pad to 32x32 and decimate rows by 4
    # (x4[r, n*8+u, j] = x_pad[n, 4u+r, j]).  Same byte count as the raw input.
    x_pad = jnp.pad(x_nchw.reshape(n, IN_HW, IN_HW).astype(f32),
                    ((0, 0), (2, 2), (2, 2)))
    x4 = jnp.transpose(x_pad.reshape(n, 8, 4, 32), (2, 0, 1, 3)).reshape(4, n * 8, 32)

    w1, b1 = _pack_conv1(params["conv1_w"], params["conv1_b"])
    w2, b2 = _pack_conv2(params["conv2_w"], params["conv2_b"])
    # fc1.weight is (120, 400) over a (C=16, H=5, W=5) flatten; reorder its
    # columns to the kernel's (pi, pj, co) flatten and present it as (400, 120).
    fc1w = jnp.transpose(params["fc1_w"].reshape(120, 16, 5, 5),
                         (2, 3, 1, 0)).reshape(400, 120)
    fc1b = params["fc1_b"].reshape(1, 120)
    fc2w = jnp.transpose(params["fc2_w"], (1, 0))                 # (120, 84)
    fc2b = params["fc2_b"].reshape(1, 84)
    fc3w = jnp.transpose(params["fc3_w"], (1, 0))                 # (84, 10)
    fc3b = params["fc3_b"].reshape(1, 10)
    # One-hot selector picking fc-slot row n*8 for each image in the block.
    sel = jnp.zeros((nb, R - 4), f32).at[jnp.arange(nb), 8 * jnp.arange(nb)].set(1.0)

    def full_spec(a):
        nd = a.ndim
        return pl.BlockSpec(a.shape, lambda i, _nd=nd: (0,) * _nd)

    consts = (w1, b1, w2, b2, fc1w, fc1b, fc2w, fc2b, fc3w, fc3b, sel)
    return pl.pallas_call(
        _lenet_kernel,
        out_shape=jax.ShapeDtypeStruct((n, 10), f32),
        grid=(n // nb,),
        in_specs=[pl.BlockSpec((4, R, 32), lambda i: (0, i, 0))]
                 + [full_spec(c) for c in consts],
        out_specs=pl.BlockSpec((nb, 10), lambda i: (i, 0)),
        scratch_shapes=[
            pltpu.VMEM((R, 84), f32),     # pool1 output, even pooled rows
            pltpu.VMEM((R, 84), f32),     # pool1 output, odd pooled rows
            pltpu.VMEM((R, 80), f32),     # pool2 output
        ],
        compiler_params=pltpu.CompilerParams(
            dimension_semantics=("parallel",)),
    )(x4, *consts)


def init_params(key):
    """Deterministic PyTorch-default-style init (U(-1/sqrt(fan_in), 1/sqrt(fan_in)))."""
    def uni(k, shape, fan_in):
        bound = 1.0 / (fan_in ** 0.5)
        return jax.random.uniform(k, shape, jnp.float32, -bound, bound)
    ks = jax.random.split(key, 10)
    return {
        "conv1_w": uni(ks[0], (6, 1, 5, 5), 1 * 25),
        "conv1_b": uni(ks[1], (6,), 1 * 25),
        "conv2_w": uni(ks[2], (16, 6, 5, 5), 6 * 25),
        "conv2_b": uni(ks[3], (16,), 6 * 25),
        "fc1_w":   uni(ks[4], (120, 400), 400),
        "fc1_b":   uni(ks[5], (120,), 400),
        "fc2_w":   uni(ks[6], (84, 120), 120),
        "fc2_b":   uni(ks[7], (84,), 120),
        "fc3_w":   uni(ks[8], (10, 84), 84),
        "fc3_b":   uni(ks[9], (10,), 84),
    }


def lenet_reference(x_nchw, p):
    """Pure-JAX reference matching the PyTorch forward (for validation)."""
    def conv(x, w, b, pad):
        y = lax.conv_general_dilated(x, w, (1, 1), [(pad, pad), (pad, pad)],
                                     dimension_numbers=("NCHW", "OIHW", "NCHW"))
        return y + b.reshape(1, -1, 1, 1)

    def pool(x):
        return lax.reduce_window(x, -jnp.inf, lax.max,
                                 (1, 1, 2, 2), (1, 1, 2, 2), "VALID")

    x = pool(jnp.maximum(conv(x_nchw, p["conv1_w"], p["conv1_b"], 2), 0.0))
    x = pool(jnp.maximum(conv(x, p["conv2_w"], p["conv2_b"], 0), 0.0))
    x = x.reshape(x.shape[0], -1)                       # (N, 16*5*5), (C,H,W) order
    x = jnp.maximum(x @ p["fc1_w"].T + p["fc1_b"], 0.0)
    x = jnp.maximum(x @ p["fc2_w"].T + p["fc2_b"], 0.0)
    return x @ p["fc3_w"].T + p["fc3_b"]


if __name__ == "__main__":
    key = jax.random.PRNGKey(0)
    k_x, k_p = jax.random.split(key)
    # PyTorch-style NCHW input; 28x28 so the flatten is 16*5*5 = 400 as fc1 expects.
    x = jax.random.normal(k_x, (N_BATCH, 1, IN_HW, IN_HW), jnp.float32)
    params = init_params(k_p)

    logits = jax.block_until_ready(lenet_forward(x, params))
    ref = lenet_reference(x, params)
    assert logits.shape == (N_BATCH, 10)
    assert jnp.allclose(logits, ref, atol=1e-3, rtol=1e-3), (logits, ref)
    # NOTE: the module's nn.CrossEntropyLoss is defined but never used in forward().
    print("KERNEL_OK")
</pallas_src>

<mosaic_0001>
module attributes {stable_mosaic.version = 11 : i64} {
  func.func @_lenet_kernel(%arg0: i32, %arg1: memref<4x16x32xf32, #tpu.memory_space<vmem>>, %arg2: memref<5x32x212xf32, #tpu.memory_space<vmem>>, %arg3: memref<1x84xf32, #tpu.memory_space<vmem>>, %arg4: memref<5x84x208xf32, #tpu.memory_space<vmem>>, %arg5: memref<1x80xf32, #tpu.memory_space<vmem>>, %arg6: memref<400x120xf32, #tpu.memory_space<vmem>>, %arg7: memref<1x120xf32, #tpu.memory_space<vmem>>, %arg8: memref<120x84xf32, #tpu.memory_space<vmem>>, %arg9: memref<1x84xf32, #tpu.memory_space<vmem>>, %arg10: memref<84x10xf32, #tpu.memory_space<vmem>>, %arg11: memref<1x10xf32, #tpu.memory_space<vmem>>, %arg12: memref<2x12xf32, #tpu.memory_space<vmem>>, %arg13: memref<2x10xf32, #tpu.memory_space<vmem>>, %arg14: memref<16x84xf32, #tpu.memory_space<vmem>>, %arg15: memref<16x84xf32, #tpu.memory_space<vmem>>, %arg16: memref<16x80xf32, #tpu.memory_space<vmem>>) attributes {dimension_semantics = [#tpu.dimension_semantics<parallel>], iteration_bounds = array<i64: 1>, scalar_prefetch = 0 : i64, scratch_operands = 3 : i64, tpu.core_type = #tpu.core_type<tc>, window_params = [{transform_indices = @transform_0, window_bounds = array<i64: 4, 16, 32>}, {pipeline_mode = #tpu.pipeline_mode<synchronous>, transform_indices = @transform_1, window_bounds = array<i64: 5, 32, 212>}, {pipeline_mode = #tpu.pipeline_mode<synchronous>, transform_indices = @transform_2, window_bounds = array<i64: 1, 84>}, {pipeline_mode = #tpu.pipeline_mode<synchronous>, transform_indices = @transform_3, window_bounds = array<i64: 5, 84, 208>}, {pipeline_mode = #tpu.pipeline_mode<synchronous>, transform_indices = @transform_4, window_bounds = array<i64: 1, 80>}, {pipeline_mode = #tpu.pipeline_mode<synchronous>, transform_indices = @transform_5, window_bounds = array<i64: 400, 120>}, {pipeline_mode = #tpu.pipeline_mode<synchronous>, transform_indices = @transform_6, window_bounds = array<i64: 1, 120>}, {pipeline_mode = #tpu.pipeline_mode<synchronous>, transform_indices = @transform_7, window_bounds = array<i64: 120, 84>}, {pipeline_mode = #tpu.pipeline_mode<synchronous>, transform_indices = @transform_8, window_bounds = array<i64: 1, 84>}, {pipeline_mode = #tpu.pipeline_mode<synchronous>, transform_indices = @transform_9, window_bounds = array<i64: 84, 10>}, {pipeline_mode = #tpu.pipeline_mode<synchronous>, transform_indices = @transform_10, window_bounds = array<i64: 1, 10>}, {pipeline_mode = #tpu.pipeline_mode<synchronous>, transform_indices = @transform_11, window_bounds = array<i64: 2, 12>}, {transform_indices = @transform_12, window_bounds = array<i64: 2, 10>}]} {
    %cst = arith.constant 0.000000e+00 : f32
    %0 = vector.broadcast %cst : f32 to vector<16x84xf32>
    %c0 = arith.constant 0 : index
    %c0_0 = arith.constant 0 : index
    %1 = vector.load %arg14[%c0, %c0_0] : memref<16x84xf32, #tpu.memory_space<vmem>>, vector<16x84xf32>
    tpu.vector_store %arg14[%c0, %c0_0], %0 {strides = array<i32>} : memref<16x84xf32, #tpu.memory_space<vmem>>, vector<16x84xf32>,
    %cst_1 = arith.constant 0.000000e+00 : f32
    %2 = vector.broadcast %cst_1 : f32 to vector<16x84xf32>
    %c0_2 = arith.constant 0 : index
    %c0_3 = arith.constant 0 : index
    %3 = vector.load %arg15[%c0_2, %c0_3] : memref<16x84xf32, #tpu.memory_space<vmem>>, vector<16x84xf32>
    tpu.vector_store %arg15[%c0_2, %c0_3], %2 {strides = array<i32>} : memref<16x84xf32, #tpu.memory_space<vmem>>, vector<16x84xf32>,
    %cst_4 = arith.constant 0.000000e+00 : f32
    %4 = vector.broadcast %cst_4 : f32 to vector<16x80xf32>
    %c0_5 = arith.constant 0 : index
    %c0_6 = arith.constant 0 : index
    %5 = vector.load %arg16[%c0_5, %c0_6] : memref<16x80xf32, #tpu.memory_space<vmem>>, vector<16x80xf32>
    tpu.vector_store %arg16[%c0_5, %c0_6], %4 {strides = array<i32>} : memref<16x80xf32, #tpu.memory_space<vmem>>, vector<16x80xf32>,
    %c0_7 = arith.constant 0 : index
    %c0_8 = arith.constant 0 : index
    %c0_9 = arith.constant 0 : index
    %6 = vector.load %arg1[%c0_7, %c0_8, %c0_9] : memref<4x16x32xf32, #tpu.memory_space<vmem>>, vector<1x15x32xf32>
    %7 = vector.shape_cast %6 : vector<1x15x32xf32> to vector<15x32xf32>
    %c0_10 = arith.constant 0 : index
    %c0_11 = arith.constant 0 : index
    %c0_12 = arith.constant 0 : index
    %8 = vector.load %arg2[%c0_10, %c0_11, %c0_12] : memref<5x32x212xf32, #tpu.memory_space<vmem>>, vector<1x32x212xf32>
    %9 = vector.shape_cast %8 : vector<1x32x212xf32> to vector<32x212xf32>
    %cst_13 = arith.constant dense<0.000000e+00> : vector<15x212xf32>
    %10 = tpu.matmul %7, %9, %cst_13 {dimension_numbers = #tpu.dot_dimension_numbers<[1], [0], [0], [1], [0, 0, 1, 1], [], []>} : vector<15x32xf32>, vector<32x212xf32>, vector<15x212xf32> -> vector<15x212xf32>
    %c1 = arith.constant 1 : index
    %c0_14 = arith.constant 0 : index
    %c0_15 = arith.constant 0 : index
    %11 = vector.load %arg1[%c1, %c0_14, %c0_15] : memref<4x16x32xf32, #tpu.memory_space<vmem>>, vector<1x15x32xf32>
    %12 = vector.shape_cast %11 : vector<1x15x32xf32> to vector<15x32xf32>
    %c1_16 = arith.constant 1 : index
    %c0_17 = arith.constant 0 : index
    %c0_18 = arith.constant 0 : index
    %13 = vector.load %arg2[%c1_16, %c0_17, %c0_18] : memref<5x32x212xf32, #tpu.memory_space<vmem>>, vector<1x32x212xf32>
    %14 = vector.shape_cast %13 : vector<1x32x212xf32> to vector<32x212xf32>
    %cst_19 = arith.constant dense<0.000000e+00> : vector<15x212xf32>
    %15 = tpu.matmul %12, %14, %cst_19 {dimension_numbers = #tpu.dot_dimension_numbers<[1], [0], [0], [1], [0, 0, 1, 1], [], []>} : vector<15x32xf32>, vector<32x212xf32>, vector<15x212xf32> -> vector<15x212xf32>
    %16 = arith.addf %10, %15 : vector<15x212xf32>
    %c2 = arith.constant 2 : index
    %c0_20 = arith.constant 0 : index
    %c0_21 = arith.constant 0 : index
    %17 = vector.load %arg1[%c2, %c0_20, %c0_21] : memref<4x16x32xf32, #tpu.memory_space<vmem>>, vector<1x15x32xf32>
    %18 = vector.shape_cast %17 : vector<1x15x32xf32> to vector<15x32xf32>
    %c2_22 = arith.constant 2 : index
    %c0_23 = arith.constant 0 : index
    %c0_24 = arith.constant 0 : index
    %19 = vector.load %arg2[%c2_22, %c0_23, %c0_24] : memref<5x32x212xf32, #tpu.memory_space<vmem>>, vector<1x32x212xf32>
    %20 = vector.shape_cast %19 : vector<1x32x212xf32> to vector<32x212xf32>
    %cst_25 = arith.constant dense<0.000000e+00> : vector<15x212xf32>
    %21 = tpu.matmul %18, %20, %cst_25 {dimension_numbers = #tpu.dot_dimension_numbers<[1], [0], [0], [1], [0, 0, 1, 1], [], []>} : vector<15x32xf32>, vector<32x212xf32>, vector<15x212xf32> -> vector<15x212xf32>
    %22 = arith.addf %16, %21 : vector<15x212xf32>
    %c3 = arith.constant 3 : index
    %c0_26 = arith.constant 0 : index
    %c0_27 = arith.constant 0 : index
    %23 = vector.load %arg1[%c3, %c0_26, %c0_27] : memref<4x16x32xf32, #tpu.memory_space<vmem>>, vector<1x15x32xf32>
    %24 = vector.shape_cast %23 : vector<1x15x32xf32> to vector<15x32xf32>
    %c3_28 = arith.constant 3 : index
    %c0_29 = arith.constant 0 : index
    %c0_30 = arith.constant 0 : index
    %25 = vector.load %arg2[%c3_28, %c0_29, %c0_30] : memref<5x32x212xf32, #tpu.memory_space<vmem>>, vector<1x32x212xf32>
    %26 = vector.shape_cast %25 : vector<1x32x212xf32> to vector<32x212xf32>
    %cst_31 = arith.constant dense<0.000000e+00> : vector<15x212xf32>
    %27 = tpu.matmul %24, %26, %cst_31 {dimension_numbers = #tpu.dot_dimension_numbers<[1], [0], [0], [1], [0, 0, 1, 1], [], []>} : vector<15x32xf32>, vector<32x212xf32>, vector<15x212xf32> -> vector<15x212xf32>
    %28 = arith.addf %22, %27 : vector<15x212xf32>
    %c0_32 = arith.constant 0 : index
    %c1_33 = arith.constant 1 : index
    %c0_34 = arith.constant 0 : index
    %29 = vector.load %arg1[%c0_32, %c1_33, %c0_34] : memref<4x16x32xf32, #tpu.memory_space<vmem>>, vector<1x15x32xf32>
    %30 = vector.shape_cast %29 : vector<1x15x32xf32> to vector<15x32xf32>
    %c4 = arith.constant 4 : index
    %c0_35 = arith.constant 0 : index
    %c0_36 = arith.constant 0 : index
    %31 = vector.load %arg2[%c4, %c0_35, %c0_36] : memref<5x32x212xf32, #tpu.memory_space<vmem>>, vector<1x32x212xf32>
    %32 = vector.shape_cast %31 : vector<1x32x212xf32> to vector<32x212xf32>
    %cst_37 = arith.constant dense<0.000000e+00> : vector<15x212xf32>
    %33 = tpu.matmul %30, %32, %cst_37 {dimension_numbers = #tpu.dot_dimension_numbers<[1], [0], [0], [1], [0, 0, 1, 1], [], []>} : vector<15x32xf32>, vector<32x212xf32>, vector<15x212xf32> -> vector<15x212xf32>
    %34 = arith.addf %28, %33 : vector<15x212xf32>
    %35 = vector.extract_strided_slice %34 {offsets = [0, 0], sizes = [15, 84], strides = [1, 1]} : vector<15x212xf32> to vector<15x84xf32>
    %36 = vector.extract_strided_slice %34 {offsets = [0, 128], sizes = [15, 84], strides = [1, 1]} : vector<15x212xf32> to vector<15x84xf32>
    %37 = arith.maximumf %35, %36 : vector<15x84xf32>
    %c1_38 = arith.constant 1 : index
    %c0_39 = arith.constant 0 : index
    %c0_40 = arith.constant 0 : index
    %38 = vector.load %arg1[%c1_38, %c0_39, %c0_40] : memref<4x16x32xf32, #tpu.memory_space<vmem>>, vector<1x15x32xf32>
    %39 = vector.shape_cast %38 : vector<1x15x32xf32> to vector<15x32xf32>
    %c0_41 = arith.constant 0 : index
    %c0_42 = arith.constant 0 : index
    %c0_43 = arith.constant 0 : index
    %40 = vector.load %arg2[%c0_41, %c0_42, %c0_43] : memref<5x32x212xf32, #tpu.memory_space<vmem>>, vector<1x32x212xf32>
    %41 = vector.shape_cast %40 : vector<1x32x212xf32> to vector<32x212xf32>
    %cst_44 = arith.constant dense<0.000000e+00> : vector<15x212xf32>
    %42 = tpu.matmul %39, %41, %cst_44 {dimension_numbers = #tpu.dot_dimension_numbers<[1], [0], [0], [1], [0, 0, 1, 1], [], []>} : vector<15x32xf32>, vector<32x212xf32>, vector<15x212xf32> -> vector<15x212xf32>
    %c2_45 = arith.constant 2 : index
    %c0_46 = arith.constant 0 : index
    %c0_47 = arith.constant 0 : index
    %43 = vector.load %arg1[%c2_45, %c0_46, %c0_47] : memref<4x16x32xf32, #tpu.memory_space<vmem>>, vector<1x15x32xf32>
    %44 = vector.shape_cast %43 : vector<1x15x32xf32> to vector<15x32xf32>
    %c1_48 = arith.constant 1 : index
    %c0_49 = arith.constant 0 : index
    %c0_50 = arith.constant 0 : index
    %45 = vector.load %arg2[%c1_48, %c0_49, %c0_50] : memref<5x32x212xf32, #tpu.memory_space<vmem>>, vector<1x32x212xf32>
    %46 = vector.shape_cast %45 : vector<1x32x212xf32> to vector<32x212xf32>
    %cst_51 = arith.constant dense<0.000000e+00> : vector<15x212xf32>
    %47 = tpu.matmul %44, %46, %cst_51 {dimension_numbers = #tpu.dot_dimension_numbers<[1], [0], [0], [1], [0, 0, 1, 1], [], []>} : vector<15x32xf32>, vector<32x212xf32>, vector<15x212xf32> -> vector<15x212xf32>
    %48 = arith.addf %42, %47 : vector<15x212xf32>
    %c3_52 = arith.constant 3 : index
    %c0_53 = arith.constant 0 : index
    %c0_54 = arith.constant 0 : index
    %49 = vector.load %arg1[%c3_52, %c0_53, %c0_54] : memref<4x16x32xf32, #tpu.memory_space<vmem>>, vector<1x15x32xf32>
    %50 = vector.shape_cast %49 : vector<1x15x32xf32> to vector<15x32xf32>
    %c2_55 = arith.constant 2 : index
    %c0_56 = arith.constant 0 : index
    %c0_57 = arith.constant 0 : index
    %51 = vector.load %arg2[%c2_55, %c0_56, %c0_57] : memref<5x32x212xf32, #tpu.memory_space<vmem>>, vector<1x32x212xf32>
    %52 = vector.shape_cast %51 : vector<1x32x212xf32> to vector<32x212xf32>
    %cst_58 = arith.constant dense<0.000000e+00> : vector<15x212xf32>
    %53 = tpu.matmul %50, %52, %cst_58 {dimension_numbers = #tpu.dot_dimension_numbers<[1], [0], [0], [1], [0, 0, 1, 1], [], []>} : vector<15x32xf32>, vector<32x212xf32>, vector<15x212xf32> -> vector<15x212xf32>
    %54 = arith.addf %48, %53 : vector<15x212xf32>
    %c0_59 = arith.constant 0 : index
    %c1_60 = arith.constant 1 : index
    %c0_61 = arith.constant 0 : index
    %55 = vector.load %arg1[%c0_59, %c1_60, %c0_61] : memref<4x16x32xf32, #tpu.memory_space<vmem>>, vector<1x15x32xf32>
    %56 = vector.shape_cast %55 : vector<1x15x32xf32> to vector<15x32xf32>
    %c3_62 = arith.constant 3 : index
    %c0_63 = arith.constant 0 : index
    %c0_64 = arith.constant 0 : index
    %57 = vector.load %arg2[%c3_62, %c0_63, %c0_64] : memref<5x32x212xf32, #tpu.memory_space<vmem>>, vector<1x32x212xf32>
    %58 = vector.shape_cast %57 : vector<1x32x212xf32> to vector<32x212xf32>
    %cst_65 = arith.constant dense<0.000000e+00> : vector<15x212xf32>
    %59 = tpu.matmul %56, %58, %cst_65 {dimension_numbers = #tpu.dot_dimension_numbers<[1], [0], [0], [1], [0, 0, 1, 1], [], []>} : vector<15x32xf32>, vector<32x212xf32>, vector<15x212xf32> -> vector<15x212xf32>
    %60 = arith.addf %54, %59 : vector<15x212xf32>
    %c1_66 = arith.constant 1 : index
    %c1_67 = arith.constant 1 : index
    %c0_68 = arith.constant 0 : index
    %61 = vector.load %arg1[%c1_66, %c1_67, %c0_68] : memref<4x16x32xf32, #tpu.memory_space<vmem>>, vector<1x15x32xf32>
    %62 = vector.shape_cast %61 : vector<1x15x32xf32> to vector<15x32xf32>
    %c4_69 = arith.constant 4 : index
    %c0_70 = arith.constant 0 : index
    %c0_71 = arith.constant 0 : index
    %63 = vector.load %arg2[%c4_69, %c0_70, %c0_71] : memref<5x32x212xf32, #tpu.memory_space<vmem>>, vector<1x32x212xf32>
    %64 = vector.shape_cast %63 : vector<1x32x212xf32> to vector<32x212xf32>
    %cst_72 = arith.constant dense<0.000000e+00> : vector<15x212xf32>
    %65 = tpu.matmul %62, %64, %cst_72 {dimension_numbers = #tpu.dot_dimension_numbers<[1], [0], [0], [1], [0, 0, 1, 1], [], []>} : vector<15x32xf32>, vector<32x212xf32>, vector<15x212xf32> -> vector<15x212xf32>
    %66 = arith.addf %60, %65 : vector<15x212xf32>
    %67 = vector.extract_strided_slice %66 {offsets = [0, 0], sizes = [15, 84], strides = [1, 1]} : vector<15x212xf32> to vector<15x84xf32>
    %68 = vector.extract_strided_slice %66 {offsets = [0, 128], sizes = [15, 84], strides = [1, 1]} : vector<15x212xf32> to vector<15x84xf32>
    %69 = arith.maximumf %67, %68 : vector<15x84xf32>
    %70 = arith.maximumf %37, %69 : vector<15x84xf32>
    %c0_73 = arith.constant 0 : index
    %c0_74 = arith.constant 0 : index
    %71 = vector.load %arg3[%c0_73, %c0_74] : memref<1x84xf32, #tpu.memory_space<vmem>>, vector<1x84xf32>
    %72 = vector.broadcast %71 : vector<1x84xf32> to vector<15x84xf32>
    %73 = arith.addf %70, %72 : vector<15x84xf32>
    %cst_75 = arith.constant 0.000000e+00 : f32
    %74 = vector.broadcast %cst_75 : f32 to vector<15x84xf32>
    %75 = arith.maximumf %73, %74 : vector<15x84xf32>
    %c0_76 = arith.constant 0 : index
    %c0_77 = arith.constant 0 : index
    %76 = vector.load %arg14[%c0_76, %c0_77] : memref<16x84xf32, #tpu.memory_space<vmem>>, vector<15x84xf32>
    tpu.vector_store %arg14[%c0_76, %c0_77], %75 {strides = array<i32>} : memref<16x84xf32, #tpu.memory_space<vmem>>, vector<15x84xf32>,
    %c2_78 = arith.constant 2 : index
    %c0_79 = arith.constant 0 : index
    %c0_80 = arith.constant 0 : index
    %77 = vector.load %arg1[%c2_78, %c0_79, %c0_80] : memref<4x16x32xf32, #tpu.memory_space<vmem>>, vector<1x15x32xf32>
    %78 = vector.shape_cast %77 : vector<1x15x32xf32> to vector<15x32xf32>
    %c0_81 = arith.constant 0 : index
    %c0_82 = arith.constant 0 : index
    %c0_83 = arith.constant 0 : index
    %79 = vector.load %arg2[%c0_81, %c0_82, %c0_83] : memref<5x32x212xf32, #tpu.memory_space<vmem>>, vector<1x32x212xf32>
    %80 = vector.shape_cast %79 : vector<1x32x212xf32> to vector<32x212xf32>
    %cst_84 = arith.constant dense<0.000000e+00> : vector<15x212xf32>
    %81 = tpu.matmul %78, %80, %cst_84 {dimension_numbers = #tpu.dot_dimension_numbers<[1], [0], [0], [1], [0, 0, 1, 1], [], []>} : vector<15x32xf32>, vector<32x212xf32>, vector<15x212xf32> -> vector<15x212xf32>
    %c3_85 = arith.constant 3 : index
    %c0_86 = arith.constant 0 : index
    %c0_87 = arith.constant 0 : index
    %82 = vector.load %arg1[%c3_85, %c0_86, %c0_87] : memref<4x16x32xf32, #tpu.memory_space<vmem>>, vector<1x15x32xf32>
    %83 = vector.shape_cast %82 : vector<1x15x32xf32> to vector<15x32xf32>
    %c1_88 = arith.constant 1 : index
    %c0_89 = arith.constant 0 : index
    %c0_90 = arith.constant 0 : index
    %84 = vector.load %arg2[%c1_88, %c0_89, %c0_90] : memref<5x32x212xf32, #tpu.memory_space<vmem>>, vector<1x32x212xf32>
    %85 = vector.shape_cast %84 : vector<1x32x212xf32> to vector<32x212xf32>
    %cst_91 = arith.constant dense<0.000000e+00> : vector<15x212xf32>
    %86 = tpu.matmul %83, %85, %cst_91 {dimension_numbers = #tpu.dot_dimension_numbers<[1], [0], [0], [1], [0, 0, 1, 1], [], []>} : vector<15x32xf32>, vector<32x212xf32>, vector<15x212xf32> -> vector<15x212xf32>
    %87 = arith.addf %81, %86 : vector<15x212xf32>
    %c0_92 = arith.constant 0 : index
    %c1_93 = arith.constant 1 : index
    %c0_94 = arith.constant 0 : index
    %88 = vector.load %arg1[%c0_92, %c1_93, %c0_94] : memref<4x16x32xf32, #tpu.memory_space<vmem>>, vector<1x15x32xf32>
    %89 = vector.shape_cast %88 : vector<1x15x32xf32> to vector<15x32xf32>
    %c2_95 = arith.constant 2 : index
    %c0_96 = arith.constant 0 : index
    %c0_97 = arith.constant 0 : index
    %90 = vector.load %arg2[%c2_95, %c0_96, %c0_97] : memref<5x32x212xf32, #tpu.memory_space<vmem>>, vector<1x32x212xf32>
    %91 = vector.shape_cast %90 : vector<1x32x212xf32> to vector<32x212xf32>
    %cst_98 = arith.constant dense<0.000000e+00> : vector<15x212xf32>
    %92 = tpu.matmul %89, %91, %cst_98 {dimension_numbers = #tpu.dot_dimension_numbers<[1], [0], [0], [1], [0, 0, 1, 1], [], []>} : vector<15x32xf32>, vector<32x212xf32>, vector<15x212xf32> -> vector<15x212xf32>
    %93 = arith.addf %87, %92 : vector<15x212xf32>
    %c1_99 = arith.constant 1 : index
    %c1_100 = arith.constant 1 : index
    %c0_101 = arith.constant 0 : index
    %94 = vector.load %arg1[%c1_99, %c1_100, %c0_101] : memref<4x16x32xf32, #tpu.memory_space<vmem>>, vector<1x15x32xf32>
    %95 = vector.shape_cast %94 : vector<1x15x32xf32> to vector<15x32xf32>
    %c3_102 = arith.constant 3 : index
    %c0_103 = arith.constant 0 : index
    %c0_104 = arith.constant 0 : index
    %96 = vector.load %arg2[%c3_102, %c0_103, %c0_104] : memref<5x32x212xf32, #tpu.memory_space<vmem>>, vector<1x32x212xf32>
    %97 = vector.shape_cast %96 : vector<1x32x212xf32> to vector<32x212xf32>
    %cst_105 = arith.constant dense<0.000000e+00> : vector<15x212xf32>
    %98 = tpu.matmul %95, %97, %cst_105 {dimension_numbers = #tpu.dot_dimension_numbers<[1], [0], [0], [1], [0, 0, 1, 1], [], []>} : vector<15x32xf32>, vector<32x212xf32>, vector<15x212xf32> -> vector<15x212xf32>
    %99 = arith.addf %93, %98 : vector<15x212xf32>
    %c2_106 = arith.constant 2 : index
    %c1_107 = arith.constant 1 : index
    %c0_108 = arith.constant 0 : index
    %100 = vector.load %arg1[%c2_106, %c1_107, %c0_108] : memref<4x16x32xf32, #tpu.memory_space<vmem>>, vector<1x15x32xf32>
    %101 = vector.shape_cast %100 : vector<1x15x32xf32> to vector<15x32xf32>
    %c4_109 = arith.constant 4 : index
    %c0_110 = arith.constant 0 : index
    %c0_111 = arith.constant 0 : index
    %102 = vector.load %arg2[%c4_109, %c0_110, %c0_111] : memref<5x32x212xf32, #tpu.memory_space<vmem>>, vector<1x32x212xf32>
    %103 = vector.shape_cast %102 : vector<1x32x212xf32> to vector<32x212xf32>
    %cst_112 = arith.constant dense<0.000000e+00> : vector<15x212xf32>
    %104 = tpu.matmul %101, %103, %cst_112 {dimension_numbers = #tpu.dot_dimension_numbers<[1], [0], [0], [1], [0, 0, 1, 1], [], []>} : vector<15x32xf32>, vector<32x212xf32>, vector<15x212xf32> -> vector<15x212xf32>
    %105 = arith.addf %99, %104 : vector<15x212xf32>
    %106 = vector.extract_strided_slice %105 {offsets = [0, 0], sizes = [15, 84], strides = [1, 1]} : vector<15x212xf32> to vector<15x84xf32>
    %107 = vector.extract_strided_slice %105 {offsets = [0, 128], sizes = [15, 84], strides = [1, 1]} : vector<15x212xf32> to vector<15x84xf32>
    %108 = arith.maximumf %106, %107 : vector<15x84xf32>
    %c3_113 = arith.constant 3 : index
    %c0_114 = arith.constant 0 : index
    %c0_115 = arith.constant 0 : index
    %109 = vector.load %arg1[%c3_113, %c0_114, %c0_115] : memref<4x16x32xf32, #tpu.memory_space<vmem>>, vector<1x15x32xf32>
    %110 = vector.shape_cast %109 : vector<1x15x32xf32> to vector<15x32xf32>
    %c0_116 = arith.constant 0 : index
    %c0_117 = arith.constant 0 : index
    %c0_118 = arith.constant 0 : index
    %111 = vector.load %arg2[%c0_116, %c0_117, %c0_118] : memref<5x32x212xf32, #tpu.memory_space<vmem>>, vector<1x32x212xf32>
    %112 = vector.shape_cast %111 : vector<1x32x212xf32> to vector<32x212xf32>
    %cst_119 = arith.constant dense<0.000000e+00> : vector<15x212xf32>
    %113 = tpu.matmul %110, %112, %cst_119 {dimension_numbers = #tpu.dot_dimension_numbers<[1], [0], [0], [1], [0, 0, 1, 1], [], []>} : vector<15x32xf32>, vector<32x212xf32>, vector<15x212xf32> -> vector<15x212xf32>
    %c0_120 = arith.constant 0 : index
    %c1_121 = arith.constant 1 : index
    %c0_122 = arith.constant 0 : index
    %114 = vector.load %arg1[%c0_120, %c1_121, %c0_122] : memref<4x16x32xf32, #tpu.memory_space<vmem>>, vector<1x15x32xf32>
    %115 = vector.shape_cast %114 : vector<1x15x32xf32> to vector<15x32xf32>
    %c1_123 = arith.constant 1 : index
    %c0_124 = arith.constant 0 : index
    %c0_125 = arith.constant 0 : index
    %116 = vector.load %arg2[%c1_123, %c0_124, %c0_125] : memref<5x32x212xf32, #tpu.memory_space<vmem>>, vector<1x32x212xf32>
    %117 = vector.shape_cast %116 : vector<1x32x212xf32> to vector<32x212xf32>
    %cst_126 = arith.constant dense<0.000000e+00> : vector<15x212xf32>
    %118 = tpu.matmul %115, %117, %cst_126 {dimension_numbers = #tpu.dot_dimension_numbers<[1], [0], [0], [1], [0, 0, 1, 1], [], []>} : vector<15x32xf32>, vector<32x212xf32>, vector<15x212xf32> -> vector<15x212xf32>
    %119 = arith.addf %113, %118 : vector<15x212xf32>
    %c1_127 = arith.constant 1 : index
    %c1_128 = arith.constant 1 : index
    %c0_129 = arith.constant 0 : index
    %120 = vector.load %arg1[%c1_127, %c1_128, %c0_129] : memref<4x16x32xf32, #tpu.memory_space<vmem>>, vector<1x15x32xf32>
    %121 = vector.shape_cast %120 : vector<1x15x32xf32> to vector<15x32xf32>
    %c2_130 = arith.constant 2 : index
    %c0_131 = arith.constant 0 : index
    %c0_132 = arith.constant 0 : index
    %122 = vector.load %arg2[%c2_130, %c0_131, %c0_132] : memref<5x32x212xf32, #tpu.memory_space<vmem>>, vector<1x32x212xf32>
    %123 = vector.shape_cast %122 : vector<1x32x212xf32> to vector<32x212xf32>
    %cst_133 = arith.constant dense<0.000000e+00> : vector<15x212xf32>
    %124 = tpu.matmul %121, %123, %cst_133 {dimension_numbers = #tpu.dot_dimension_numbers<[1], [0], [0], [1], [0, 0, 1, 1], [], []>} : vector<15x32xf32>, vector<32x212xf32>, vector<15x212xf32> -> vector<15x212xf32>
    %125 = arith.addf %119, %124 : vector<15x212xf32>
    %c2_134 = arith.constant 2 : index
    %c1_135 = arith.constant 1 : index
    %c0_136 = arith.constant 0 : index
    %126 = vector.load %arg1[%c2_134, %c1_135, %c0_136] : memref<4x16x32xf32, #tpu.memory_space<vmem>>, vector<1x15x32xf32>
    %127 = vector.shape_cast %126 : vector<1x15x32xf32> to vector<15x32xf32>
    %c3_137 = arith.constant 3 : index
    %c0_138 = arith.constant 0 : index
    %c0_139 = arith.constant 0 : index
    %128 = vector.load %arg2[%c3_137, %c0_138, %c0_139] : memref<5x32x212xf32, #tpu.memory_space<vmem>>, vector<1x32x212xf32>
    %129 = vector.shape_cast %128 : vector<1x32x212xf32> to vector<32x212xf32>
    %cst_140 = arith.constant dense<0.000000e+00> : vector<15x212xf32>
    %130 = tpu.matmul %127, %129, %cst_140 {dimension_numbers = #tpu.dot_dimension_numbers<[1], [0], [0], [1], [0, 0, 1, 1], [], []>} : vector<15x32xf32>, vector<32x212xf32>, vector<15x212xf32> -> vector<15x212xf32>
    %131 = arith.addf %125, %130 : vector<15x212xf32>
    %c3_141 = arith.constant 3 : index
    %c1_142 = arith.constant 1 : index
    %c0_143 = arith.constant 0 : index
    %132 = vector.load %arg1[%c3_141, %c1_142, %c0_143] : memref<4x16x32xf32, #tpu.memory_space<vmem>>, vector<1x15x32xf32>
    %133 = vector.shape_cast %132 : vector<1x15x32xf32> to vector<15x32xf32>
    %c4_144 = arith.constant 4 : index
    %c0_145 = arith.constant 0 : index
    %c0_146 = arith.constant 0 : index
    %134 = vector.load %arg2[%c4_144, %c0_145, %c0_146] : memref<5x32x212xf32, #tpu.memory_space<vmem>>, vector<1x32x212xf32>
    %135 = vector.shape_cast %134 : vector<1x32x212xf32> to vector<32x212xf32>
    %cst_147 = arith.constant dense<0.000000e+00> : vector<15x212xf32>
    %136 = tpu.matmul %133, %135, %cst_147 {dimension_numbers = #tpu.dot_dimension_numbers<[1], [0], [0], [1], [0, 0, 1, 1], [], []>} : vector<15x32xf32>, vector<32x212xf32>, vector<15x212xf32> -> vector<15x212xf32>
    %137 = arith.addf %131, %136 : vector<15x212xf32>
    %138 = vector.extract_strided_slice %137 {offsets = [0, 0], sizes = [15, 84], strides = [1, 1]} : vector<15x212xf32> to vector<15x84xf32>
    %139 = vector.extract_strided_slice %137 {offsets = [0, 128], sizes = [15, 84], strides = [1, 1]} : vector<15x212xf32> to vector<15x84xf32>
    %140 = arith.maximumf %138, %139 : vector<15x84xf32>
    %141 = arith.maximumf %108, %140 : vector<15x84xf32>
    %c0_148 = arith.constant 0 : index
    %c0_149 = arith.constant 0 : index
    %142 = vector.load %arg3[%c0_148, %c0_149] : memref<1x84xf32, #tpu.memory_space<vmem>>, vector<1x84xf32>
    %143 = vector.broadcast %142 : vector<1x84xf32> to vector<15x84xf32>
    %144 = arith.addf %141, %143 : vector<15x84xf32>
    %cst_150 = arith.constant 0.000000e+00 : f32
    %145 = vector.broadcast %cst_150 : f32 to vector<15x84xf32>
    %146 = arith.maximumf %144, %145 : vector<15x84xf32>
    %c0_151 = arith.constant 0 : index
    %c0_152 = arith.constant 0 : index
    %147 = vector.load %arg15[%c0_151, %c0_152] : memref<16x84xf32, #tpu.memory_space<vmem>>, vector<15x84xf32>
    tpu.vector_store %arg15[%c0_151, %c0_152], %146 {strides = array<i32>} : memref<16x84xf32, #tpu.memory_space<vmem>>, vector<15x84xf32>,
    %c0_153 = arith.constant 0 : index
    %c0_154 = arith.constant 0 : index
    %148 = vector.load %arg14[%c0_153, %c0_154] : memref<16x84xf32, #tpu.memory_space<vmem>>, vector<14x84xf32>
    %c0_155 = arith.constant 0 : index
    %c0_156 = arith.constant 0 : index
    %c0_157 = arith.constant 0 : index
    %149 = vector.load %arg4[%c0_155, %c0_156, %c0_157] : memref<5x84x208xf32, #tpu.memory_space<vmem>>, vector<1x84x208xf32>
    %150 = vector.shape_cast %149 : vector<1x84x208xf32> to vector<84x208xf32>
    %cst_158 = arith.constant dense<0.000000e+00> : vector<14x208xf32>
    %151 = tpu.matmul %148, %150, %cst_158 {dimension_numbers = #tpu.dot_dimension_numbers<[1], [0], [0], [1], [0, 0, 1, 1], [], []>} : vector<14x84xf32>, vector<84x208xf32>, vector<14x208xf32> -> vector<14x208xf32>
    %c0_159 = arith.constant 0 : index
    %c0_160 = arith.constant 0 : index
    %152 = vector.load %arg15[%c0_159, %c0_160] : memref<16x84xf32, #tpu.memory_space<vmem>>, vector<14x84xf32>
    %c1_161 = arith.constant 1 : index
    %c0_162 = arith.constant 0 : index
    %c0_163 = arith.constant 0 : index
    %153 = vector.load %arg4[%c1_161, %c0_162, %c0_163] : memref<5x84x208xf32, #tpu.memory_space<vmem>>, vector<1x84x208xf32>
    %154 = vector.shape_cast %153 : vector<1x84x208xf32> to vector<84x208xf32>
    %cst_164 = arith.constant dense<0.000000e+00> : vector<14x208xf32>
    %155 = tpu.matmul %152, %154, %cst_164 {dimension_numbers = #tpu.dot_dimension_numbers<[1], [0], [0], [1], [0, 0, 1, 1], [], []>} : vector<14x84xf32>, vector<84x208xf32>, vector<14x208xf32> -> vector<14x208xf32>
    %156 = arith.addf %151, %155 : vector<14x208xf32>
    %c1_165 = arith.constant 1 : index
    %c0_166 = arith.constant 0 : index
    %157 = vector.load %arg14[%c1_165, %c0_166] : memref<16x84xf32, #tpu.memory_space<vmem>>, vector<14x84xf32>
    %c2_167 = arith.constant 2 : index
    %c0_168 = arith.constant 0 : index
    %c0_169 = arith.constant 0 : index
    %158 = vector.load %arg4[%c2_167, %c0_168, %c0_169] : memref<5x84x208xf32, #tpu.memory_space<vmem>>, vector<1x84x208xf32>
    %159 = vector.shape_cast %158 : vector<1x84x208xf32> to vector<84x208xf32>
    %cst_170 = arith.constant dense<0.000000e+00> : vector<14x208xf32>
    %160 = tpu.matmul %157, %159, %cst_170 {dimension_numbers = #tpu.dot_dimension_numbers<[1], [0], [0], [1], [0, 0, 1, 1], [], []>} : vector<14x84xf32>, vector<84x208xf32>, vector<14x208xf32> -> vector<14x208xf32>
    %161 = arith.addf %156, %160 : vector<14x208xf32>
    %c1_171 = arith.constant 1 : index
    %c0_172 = arith.constant 0 : index
    %162 = vector.load %arg15[%c1_171, %c0_172] : memref<16x84xf32, #tpu.memory_space<vmem>>, vector<14x84xf32>
    %c3_173 = arith.constant 3 : index
    %c0_174 = arith.constant 0 : index
    %c0_175 = arith.constant 0 : index
    %163 = vector.load %arg4[%c3_173, %c0_174, %c0_175] : memref<5x84x208xf32, #tpu.memory_space<vmem>>, vector<1x84x208xf32>
    %164 = vector.shape_cast %163 : vector<1x84x208xf32> to vector<84x208xf32>
    %cst_176 = arith.constant dense<0.000000e+00> : vector<14x208xf32>
    %165 = tpu.matmul %162, %164, %cst_176 {dimension_numbers = #tpu.dot_dimension_numbers<[1], [0], [0], [1], [0, 0, 1, 1], [], []>} : vector<14x84xf32>, vector<84x208xf32>, vector<14x208xf32> -> vector<14x208xf32>
    %166 = arith.addf %161, %165 : vector<14x208xf32>
    %c2_177 = arith.constant 2 : index
    %c0_178 = arith.constant 0 : index
    %167 = vector.load %arg14[%c2_177, %c0_178] : memref<16x84xf32, #tpu.memory_space<vmem>>, vector<14x84xf32>
    %c4_179 = arith.constant 4 : index
    %c0_180 = arith.constant 0 : index
    %c0_181 = arith.constant 0 : index
    %168 = vector.load %arg4[%c4_179, %c0_180, %c0_181] : memref<5x84x208xf32, #tpu.memory_space<vmem>>, vector<1x84x208xf32>
    %169 = vector.shape_cast %168 : vector<1x84x208xf32> to vector<84x208xf32>
    %cst_182 = arith.constant dense<0.000000e+00> : vector<14x208xf32>
    %170 = tpu.matmul %167, %169, %cst_182 {dimension_numbers = #tpu.dot_dimension_numbers<[1], [0], [0], [1], [0, 0, 1, 1], [], []>} : vector<14x84xf32>, vector<84x208xf32>, vector<14x208xf32> -> vector<14x208xf32>
    %171 = arith.addf %166, %170 : vector<14x208xf32>
    %172 = vector.extract_strided_slice %171 {offsets = [0, 0], sizes = [14, 80], strides = [1, 1]} : vector<14x208xf32> to vector<14x80xf32>
    %173 = vector.extract_strided_slice %171 {offsets = [0, 128], sizes = [14, 80], strides = [1, 1]} : vector<14x208xf32> to vector<14x80xf32>
    %174 = arith.maximumf %172, %173 : vector<14x80xf32>
    %c0_183 = arith.constant 0 : index
    %c0_184 = arith.constant 0 : index
    %175 = vector.load %arg15[%c0_183, %c0_184] : memref<16x84xf32, #tpu.memory_space<vmem>>, vector<14x84xf32>
    %c0_185 = arith.constant 0 : index
    %c0_186 = arith.constant 0 : index
    %c0_187 = arith.constant 0 : index
    %176 = vector.load %arg4[%c0_185, %c0_186, %c0_187] : memref<5x84x208xf32, #tpu.memory_space<vmem>>, vector<1x84x208xf32>
    %177 = vector.shape_cast %176 : vector<1x84x208xf32> to vector<84x208xf32>
    %cst_188 = arith.constant dense<0.000000e+00> : vector<14x208xf32>
    %178 = tpu.matmul %175, %177, %cst_188 {dimension_numbers = #tpu.dot_dimension_numbers<[1], [0], [0], [1], [0, 0, 1, 1], [], []>} : vector<14x84xf32>, vector<84x208xf32>, vector<14x208xf32> -> vector<14x208xf32>
    %c1_189 = arith.constant 1 : index
    %c0_190 = arith.constant 0 : index
    %179 = vector.load %arg14[%c1_189, %c0_190] : memref<16x84xf32, #tpu.memory_space<vmem>>, vector<14x84xf32>
    %c1_191 = arith.constant 1 : index
    %c0_192 = arith.constant 0 : index
    %c0_193 = arith.constant 0 : index
    %180 = vector.load %arg4[%c1_191, %c0_192, %c0_193] : memref<5x84x208xf32, #tpu.memory_space<vmem>>, vector<1x84x208xf32>
    %181 = vector.shape_cast %180 : vector<1x84x208xf32> to vector<84x208xf32>
    %cst_194 = arith.constant dense<0.000000e+00> : vector<14x208xf32>
    %182 = tpu.matmul %179, %181, %cst_194 {dimension_numbers = #tpu.dot_dimension_numbers<[1], [0], [0], [1], [0, 0, 1, 1], [], []>} : vector<14x84xf32>, vector<84x208xf32>, vector<14x208xf32> -> vector<14x208xf32>
    %183 = arith.addf %178, %182 : vector<14x208xf32>
    %c1_195 = arith.constant 1 : index
    %c0_196 = arith.constant 0 : index
    %184 = vector.load %arg15[%c1_195, %c0_196] : memref<16x84xf32, #tpu.memory_space<vmem>>, vector<14x84xf32>
    %c2_197 = arith.constant 2 : index
    %c0_198 = arith.constant 0 : index
    %c0_199 = arith.constant 0 : index
    %185 = vector.load %arg4[%c2_197, %c0_198, %c0_199] : memref<5x84x208xf32, #tpu.memory_space<vmem>>, vector<1x84x208xf32>
    %186 = vector.shape_cast %185 : vector<1x84x208xf32> to vector<84x208xf32>
    %cst_200 = arith.constant dense<0.000000e+00> : vector<14x208xf32>
    %187 = tpu.matmul %184, %186, %cst_200 {dimension_numbers = #tpu.dot_dimension_numbers<[1], [0], [0], [1], [0, 0, 1, 1], [], []>} : vector<14x84xf32>, vector<84x208xf32>, vector<14x208xf32> -> vector<14x208xf32>
    %188 = arith.addf %183, %187 : vector<14x208xf32>
    %c2_201 = arith.constant 2 : index
    %c0_202 = arith.constant 0 : index
    %189 = vector.load %arg14[%c2_201, %c0_202] : memref<16x84xf32, #tpu.memory_space<vmem>>, vector<14x84xf32>
    %c3_203 = arith.constant 3 : index
    %c0_204 = arith.constant 0 : index
    %c0_205 = arith.constant 0 : index
    %190 = vector.load %arg4[%c3_203, %c0_204, %c0_205] : memref<5x84x208xf32, #tpu.memory_space<vmem>>, vector<1x84x208xf32>
    %191 = vector.shape_cast %190 : vector<1x84x208xf32> to vector<84x208xf32>
    %cst_206 = arith.constant dense<0.000000e+00> : vector<14x208xf32>
    %192 = tpu.matmul %189, %191, %cst_206 {dimension_numbers = #tpu.dot_dimension_numbers<[1], [0], [0], [1], [0, 0, 1, 1], [], []>} : vector<14x84xf32>, vector<84x208xf32>, vector<14x208xf32> -> vector<14x208xf32>
    %193 = arith.addf %188, %192 : vector<14x208xf32>
    %c2_207 = arith.constant 2 : index
    %c0_208 = arith.constant 0 : index
    %194 = vector.load %arg15[%c2_207, %c0_208] : memref<16x84xf32, #tpu.memory_space<vmem>>, vector<14x84xf32>
    %c4_209 = arith.constant 4 : index
    %c0_210 = arith.constant 0 : index
    %c0_211 = arith.constant 0 : index
    %195 = vector.load %arg4[%c4_209, %c0_210, %c0_211] : memref<5x84x208xf32, #tpu.memory_space<vmem>>, vector<1x84x208xf32>
    %196 = vector.shape_cast %195 : vector<1x84x208xf32> to vector<84x208xf32>
    %cst_212 = arith.constant dense<0.000000e+00> : vector<14x208xf32>
    %197 = tpu.matmul %194, %196, %cst_212 {dimension_numbers = #tpu.dot_dimension_numbers<[1], [0], [0], [1], [0, 0, 1, 1], [], []>} : vector<14x84xf32>, vector<84x208xf32>, vector<14x208xf32> -> vector<14x208xf32>
    %198 = arith.addf %193, %197 : vector<14x208xf32>
    %199 = vector.extract_strided_slice %198 {offsets = [0, 0], sizes = [14, 80], strides = [1, 1]} : vector<14x208xf32> to vector<14x80xf32>
    %200 = vector.extract_strided_slice %198 {offsets = [0, 128], sizes = [14, 80], strides = [1, 1]} : vector<14x208xf32> to vector<14x80xf32>
    %201 = arith.maximumf %199, %200 : vector<14x80xf32>
    %202 = arith.maximumf %174, %201 : vector<14x80xf32>
    %c0_213 = arith.constant 0 : index
    %c0_214 = arith.constant 0 : index
    %203 = vector.load %arg5[%c0_213, %c0_214] : memref<1x80xf32, #tpu.memory_space<vmem>>, vector<1x80xf32>
    %204 = vector.broadcast %203 : vector<1x80xf32> to vector<14x80xf32>
    %205 = arith.addf %202, %204 : vector<14x80xf32>
    %cst_215 = arith.constant 0.000000e+00 : f32
    %206 = vector.broadcast %cst_215 : f32 to vector<14x80xf32>
    %207 = arith.maximumf %205, %206 : vector<14x80xf32>
    %c0_216 = arith.constant 0 : index
    %c0_217 = arith.constant 0 : index
    %208 = vector.load %arg16[%c0_216, %c0_217] : memref<16x80xf32, #tpu.memory_space<vmem>>, vector<14x80xf32>
    tpu.vector_store %arg16[%c0_216, %c0_217], %207 {strides = array<i32>} : memref<16x80xf32, #tpu.memory_space<vmem>>, vector<14x80xf32>,
    %c0_218 = arith.constant 0 : index
    %c0_219 = arith.constant 0 : index
    %209 = vector.load %arg16[%c0_218, %c0_219] : memref<16x80xf32, #tpu.memory_space<vmem>>, vector<12x80xf32>
    %c0_220 = arith.constant 0 : index
    %c0_221 = arith.constant 0 : index
    %210 = vector.load %arg6[%c0_220, %c0_221] : memref<400x120xf32, #tpu.memory_space<vmem>>, vector<80x120xf32>
    %cst_222 = arith.constant dense<0.000000e+00> : vector<12x120xf32>
    %211 = tpu.matmul %209, %210, %cst_222 {dimension_numbers = #tpu.dot_dimension_numbers<[1], [0], [0], [1], [0, 0, 1, 1], [], []>} : vector<12x80xf32>, vector<80x120xf32>, vector<12x120xf32> -> vector<12x120xf32>
    %c1_223 = arith.constant 1 : index
    %c0_224 = arith.constant 0 : index
    %212 = vector.load %arg16[%c1_223, %c0_224] : memref<16x80xf32, #tpu.memory_space<vmem>>, vector<12x80xf32>
    %c80 = arith.constant 80 : index
    %c0_225 = arith.constant 0 : index
    %213 = vector.load %arg6[%c80, %c0_225] : memref<400x120xf32, #tpu.memory_space<vmem>>, vector<80x120xf32>
    %cst_226 = arith.constant dense<0.000000e+00> : vector<12x120xf32>
    %214 = tpu.matmul %212, %213, %cst_226 {dimension_numbers = #tpu.dot_dimension_numbers<[1], [0], [0], [1], [0, 0, 1, 1], [], []>} : vector<12x80xf32>, vector<80x120xf32>, vector<12x120xf32> -> vector<12x120xf32>
    %215 = arith.addf %211, %214 : vector<12x120xf32>
    %c2_227 = arith.constant 2 : index
    %c0_228 = arith.constant 0 : index
    %216 = vector.load %arg16[%c2_227, %c0_228] : memref<16x80xf32, #tpu.memory_space<vmem>>, vector<12x80xf32>
    %c160 = arith.constant 160 : index
    %c0_229 = arith.constant 0 : index
    %217 = vector.load %arg6[%c160, %c0_229] : memref<400x120xf32, #tpu.memory_space<vmem>>, vector<80x120xf32>
    %cst_230 = arith.constant dense<0.000000e+00> : vector<12x120xf32>
    %218 = tpu.matmul %216, %217, %cst_230 {dimension_numbers = #tpu.dot_dimension_numbers<[1], [0], [0], [1], [0, 0, 1, 1], [], []>} : vector<12x80xf32>, vector<80x120xf32>, vector<12x120xf32> -> vector<12x120xf32>
    %219 = arith.addf %215, %218 : vector<12x120xf32>
    %c3_231 = arith.constant 3 : index
    %c0_232 = arith.constant 0 : index
    %220 = vector.load %arg16[%c3_231, %c0_232] : memref<16x80xf32, #tpu.memory_space<vmem>>, vector<12x80xf32>
    %c240 = arith.constant 240 : index
    %c0_233 = arith.constant 0 : index
    %221 = vector.load %arg6[%c240, %c0_233] : memref<400x120xf32, #tpu.memory_space<vmem>>, vector<80x120xf32>
    %cst_234 = arith.constant dense<0.000000e+00> : vector<12x120xf32>
    %222 = tpu.matmul %220, %221, %cst_234 {dimension_numbers = #tpu.dot_dimension_numbers<[1], [0], [0], [1], [0, 0, 1, 1], [], []>} : vector<12x80xf32>, vector<80x120xf32>, vector<12x120xf32> -> vector<12x120xf32>
    %223 = arith.addf %219, %222 : vector<12x120xf32>
    %c4_235 = arith.constant 4 : index
    %c0_236 = arith.constant 0 : index
    %224 = vector.load %arg16[%c4_235, %c0_236] : memref<16x80xf32, #tpu.memory_space<vmem>>, vector<12x80xf32>
    %c320 = arith.constant 320 : index
    %c0_237 = arith.constant 0 : index
    %225 = vector.load %arg6[%c320, %c0_237] : memref<400x120xf32, #tpu.memory_space<vmem>>, vector<80x120xf32>
    %cst_238 = arith.constant dense<0.000000e+00> : vector<12x120xf32>
    %226 = tpu.matmul %224, %225, %cst_238 {dimension_numbers = #tpu.dot_dimension_numbers<[1], [0], [0], [1], [0, 0, 1, 1], [], []>} : vector<12x80xf32>, vector<80x120xf32>, vector<12x120xf32> -> vector<12x120xf32>
    %227 = arith.addf %223, %226 : vector<12x120xf32>
    %c0_239 = arith.constant 0 : index
    %c0_240 = arith.constant 0 : index
    %228 = vector.load %arg12[%c0_239, %c0_240] : memref<2x12xf32, #tpu.memory_space<vmem>>, vector<2x12xf32>
    %cst_241 = arith.constant dense<0.000000e+00> : vector<2x120xf32>
    %229 = tpu.matmul %228, %227, %cst_241 {dimension_numbers = #tpu.dot_dimension_numbers<[1], [0], [0], [1], [0, 0, 1, 1], [], []>} : vector<2x12xf32>, vector<12x120xf32>, vector<2x120xf32> -> vector<2x120xf32>
    %c0_242 = arith.constant 0 : index
    %c0_243 = arith.constant 0 : index
    %230 = vector.load %arg7[%c0_242, %c0_243] : memref<1x120xf32, #tpu.memory_space<vmem>>, vector<1x120xf32>
    %231 = vector.broadcast %230 : vector<1x120xf32> to vector<2x120xf32>
    %232 = arith.addf %229, %231 : vector<2x120xf32>
    %cst_244 = arith.constant 0.000000e+00 : f32
    %233 = vector.broadcast %cst_244 : f32 to vector<2x120xf32>
    %234 = arith.maximumf %232, %233 : vector<2x120xf32>
    %c0_245 = arith.constant 0 : index
    %c0_246 = arith.constant 0 : index
    %235 = vector.load %arg8[%c0_245, %c0_246] : memref<120x84xf32, #tpu.memory_space<vmem>>, vector<120x84xf32>
    %cst_247 = arith.constant dense<0.000000e+00> : vector<2x84xf32>
    %236 = tpu.matmul %234, %235, %cst_247 {dimension_numbers = #tpu.dot_dimension_numbers<[1], [0], [0], [1], [0, 0, 1, 1], [], []>} : vector<2x120xf32>, vector<120x84xf32>, vector<2x84xf32> -> vector<2x84xf32>
    %c0_248 = arith.constant 0 : index
    %c0_249 = arith.constant 0 : index
    %237 = vector.load %arg9[%c0_248, %c0_249] : memref<1x84xf32, #tpu.memory_space<vmem>>, vector<1x84xf32>
    %238 = vector.broadcast %237 : vector<1x84xf32> to vector<2x84xf32>
    %239 = arith.addf %236, %238 : vector<2x84xf32>
    %cst_250 = arith.constant 0.000000e+00 : f32
    %240 = vector.broadcast %cst_250 : f32 to vector<2x84xf32>
    %241 = arith.maximumf %239, %240 : vector<2x84xf32>
    %c0_251 = arith.constant 0 : index
    %c0_252 = arith.constant 0 : index
    %242 = vector.load %arg10[%c0_251, %c0_252] : memref<84x10xf32, #tpu.memory_space<vmem>>, vector<84x10xf32>
    %cst_253 = arith.constant dense<0.000000e+00> : vector<2x10xf32>
    %243 = tpu.matmul %241, %242, %cst_253 {dimension_numbers = #tpu.dot_dimension_numbers<[1], [0], [0], [1], [0, 0, 1, 1], [], []>} : vector<2x84xf32>, vector<84x10xf32>, vector<2x10xf32> -> vector<2x10xf32>
    %c0_254 = arith.constant 0 : index
    %c0_255 = arith.constant 0 : index
    %244 = vector.load %arg11[%c0_254, %c0_255] : memref<1x10xf32, #tpu.memory_space<vmem>>, vector<1x10xf32>
    %245 = vector.broadcast %244 : vector<1x10xf32> to vector<2x10xf32>
    %246 = arith.addf %243, %245 : vector<2x10xf32>
    %c0_256 = arith.constant 0 : index
    %c0_257 = arith.constant 0 : index
    %247 = vector.load %arg13[%c0_256, %c0_257] : memref<2x10xf32, #tpu.memory_space<vmem>>, vector<2x10xf32>
    tpu.vector_store %arg13[%c0_256, %c0_257], %246 {strides = array<i32>} : memref<2x10xf32, #tpu.memory_space<vmem>>, vector<2x10xf32>,
    return
  }
  func.func @transform_0(%arg0: i32) -> (i32, i32, i32) {
    %c0_i32 = arith.constant 0 : i32
    %c0_i32_0 = arith.constant 0 : i32
    %c0_i32_1 = arith.constant 0 : i32
    return %c0_i32, %arg0, %c0_i32_0 : i32, i32, i32
  }
  func.func @transform_1(%arg0: i32) -> (i32, i32, i32) {
    %c0_i32 = arith.constant 0 : i32
    %c0_i32_0 = arith.constant 0 : i32
    %c0_i32_1 = arith.constant 0 : i32
    %c0_i32_2 = arith.constant 0 : i32
    return %c0_i32, %c0_i32_0, %c0_i32_1 : i32, i32, i32
  }
  func.func @transform_2(%arg0: i32) -> (i32, i32) {
    %c0_i32 = arith.constant 0 : i32
    %c0_i32_0 = arith.constant 0 : i32
    %c0_i32_1 = arith.constant 0 : i32
    return %c0_i32, %c0_i32_0 : i32, i32
  }
  func.func @transform_3(%arg0: i32) -> (i32, i32, i32) {
    %c0_i32 = arith.constant 0 : i32
    %c0_i32_0 = arith.constant 0 : i32
    %c0_i32_1 = arith.constant 0 : i32
    %c0_i32_2 = arith.constant 0 : i32
    return %c0_i32, %c0_i32_0, %c0_i32_1 : i32, i32, i32
  }
  func.func @transform_4(%arg0: i32) -> (i32, i32) {
    %c0_i32 = arith.constant 0 : i32
    %c0_i32_0 = arith.constant 0 : i32
    %c0_i32_1 = arith.constant 0 : i32
    return %c0_i32, %c0_i32_0 : i32, i32
  }
  func.func @transform_5(%arg0: i32) -> (i32, i32) {
    %c0_i32 = arith.constant 0 : i32
    %c0_i32_0 = arith.constant 0 : i32
    %c0_i32_1 = arith.constant 0 : i32
    return %c0_i32, %c0_i32_0 : i32, i32
  }
  func.func @transform_6(%arg0: i32) -> (i32, i32) {
    %c0_i32 = arith.constant 0 : i32
    %c0_i32_0 = arith.constant 0 : i32
    %c0_i32_1 = arith.constant 0 : i32
    return %c0_i32, %c0_i32_0 : i32, i32
  }
  func.func @transform_7(%arg0: i32) -> (i32, i32) {
    %c0_i32 = arith.constant 0 : i32
    %c0_i32_0 = arith.constant 0 : i32
    %c0_i32_1 = arith.constant 0 : i32
    return %c0_i32, %c0_i32_0 : i32, i32
  }
  func.func @transform_8(%arg0: i32) -> (i32, i32) {
    %c0_i32 = arith.constant 0 : i32
    %c0_i32_0 = arith.constant 0 : i32
    %c0_i32_1 = arith.constant 0 : i32
    return %c0_i32, %c0_i32_0 : i32, i32
  }
  func.func @transform_9(%arg0: i32) -> (i32, i32) {
    %c0_i32 = arith.constant 0 : i32
    %c0_i32_0 = arith.constant 0 : i32
    %c0_i32_1 = arith.constant 0 : i32
    return %c0_i32, %c0_i32_0 : i32, i32
  }
  func.func @transform_10(%arg0: i32) -> (i32, i32) {
    %c0_i32 = arith.constant 0 : i32
    %c0_i32_0 = arith.constant 0 : i32
    %c0_i32_1 = arith.constant 0 : i32
    return %c0_i32, %c0_i32_0 : i32, i32
  }
  func.func @transform_11(%arg0: i32) -> (i32, i32) {
    %c0_i32 = arith.constant 0 : i32
    %c0_i32_0 = arith.constant 0 : i32
    %c0_i32_1 = arith.constant 0 : i32
    return %c0_i32, %c0_i32_0 : i32, i32
  }
  func.func @transform_12(%arg0: i32) -> (i32, i32) {
    %c0_i32 = arith.constant 0 : i32
    %c0_i32_0 = arith.constant 0 : i32
    return %arg0, %c0_i32 : i32, i32
  }
}

</mosaic_0001>

<bundles_post_ra>
// kernel: tpu_custom_call.1
= control target key start
LH: loop header
LB: loop body
LE: loop exit
PB: predicated region body
PF: predicated region fallthrough
CT: control target
= control target key end

     0   :  { %17 = vsyncpa [#allocation6], 0  ;;  %s5574_s0 = inlined_call_operand.vmem [shape: f32[4,16,32], index: 0, kind: input, shape index: {}]   ;;  %s5575_s1 = inlined_call_operand.hbm [shape: f32[5,32,212], index: 1, kind: input, shape index: {}]   ;;  %s5576_s2 = inlined_call_operand.vmem [shape: f32[1,84], index: 2, kind: input, shape index: {}]   ;;  %s5577_s3 = inlined_call_operand.hbm [shape: f32[5,84,208], index: 3, kind: input, shape index: {}]   ;;  %s5578_s4 = inlined_call_operand.vmem [shape: f32[1,80], index: 4, kind: input, shape index: {}]   ;;  %s5579_s5 = inlined_call_operand.hbm [shape: f32[400,120], index: 5, kind: input, shape index: {}]   ;;  %s5580_s6 = inlined_call_operand.vmem [shape: f32[1,120], index: 6, kind: input, shape index: {}]   ;;  %s5581_s7 = inlined_call_operand.vmem [shape: f32[120,84], index: 7, kind: input, shape index: {}]   ;;  %s5582_s8 = inlined_call_operand.vmem [shape: f32[1,84], index: 8, kind: input, shape index: {}]   ;;  %s5583_s9 = inlined_call_operand.vmem [shape: f32[84,10], index: 9, kind: input, shape index: {}]   ;;  %s5584_s10 = inlined_call_operand.vmem [shape: f32[1,10], index: 10, kind: input, shape index: {}]   ;;  %s5585_s11 = inlined_call_operand.vmem [shape: f32[2,12], index: 11, kind: input, shape index: {}]   ;;  %s5586_s12 = inlined_call_operand.hbm [shape: f32[2,10], index: 12, kind: output, shape index: {}]  }
   0x1   :  { %18 = vsyncpa [#allocation9], 0 }
   0x2   :  { %19 = vsyncpa [#allocation7], 0  ;;  %s4775_s21 = smov [#allocation8]   ;;  %s4776_s23 = smov [#allocation5]  }
   0x3   :  { %s41_s22 = sshll.u32 %s4775_s21, 4  ;;  %s27_s24 = sshll.u32 %s4776_s23, 4  ;;  %s42_s22 = int_to_ptr.vmem [resolvable:$true] %s41_s22  ;;  %s4852_s24 = int_to_ptr.vmem [resolvable:$true] %s27_s24 }
   0x4   :  { %s4681_s27 = scalar_lea.hbm %s5577_s3, 14080 }
   0x5   :  { %p4682_p0 = scmp.ne.s32.totalorder %s5577_s3, %s4681_s27  ;;  %p4685_p1 = scmp.lt.u32.totalorder %s4681_s27, %s5577_s3 }
   0x7   :  { %p4687_p2 = pnand %p4685_p1, %p4682_p0 }
   0x9   :  { %4690 = shalt.err (!%p4687_p2)
}
   0xa   :  { %s4691_s14 = scalar_lea.vmem %s42_s22, 14080  ;;  %p4696_p4 = scmp.lt.s32.totalorder %s42_s22, %s42_s22 }
   0xb   :  { %p4692_p3 = scmp.ne.s32.totalorder %s42_s22, %s4691_s14  ;;  %p4697_p5 = scmp.lt.s32.totalorder %s4691_s14, %s4691_s14 }
   0xd   :  { %p4698_p6 = por %p4697_p5, %p4696_p4 }
   0xf   :  { %p4699_p7 = pnand %p4698_p6, %p4692_p3 }
  0x11   :  { %4702 = shalt.err (!%p4699_p7)
}
  0x12   :  { %s4777_s15 = smov 256   ;;  %s4778_s16 = smov 16  }
  0x13   :  { %47 = dma.hbm_to_vmem [thread:$0]  %s5577_s3, 14080, %s42_s22, [#allocation9], %s4777_s15, %s4777_s15, %s4778_s16  }
  0x14   :  { %s4703_s21 = scalar_lea.hbm %s5575_s1, 5120 }
  0x15   :  { %p4704_p8 = scmp.ne.s32.totalorder %s5575_s1, %s4703_s21  ;;  %p4707_p9 = scmp.lt.u32.totalorder %s4703_s21, %s5575_s1 }
  0x17   :  { %p4709_p10 = pnand %p4707_p9, %p4704_p8 }
  0x19   :  { %4712 = shalt.err (!%p4709_p10)
}
  0x1a   :  { %s4713_s28 = scalar_lea.vmem %s4852_s24, 5120  ;;  %p4718_p12 = scmp.lt.s32.totalorder %s4852_s24, %s4852_s24 }
  0x1b   :  { %p4714_p11 = scmp.ne.s32.totalorder %s4852_s24, %s4713_s28  ;;  %p4719_p13 = scmp.lt.s32.totalorder %s4713_s28, %s4713_s28 }
  0x1d   :  { %p4720_p0 = por %p4719_p13, %p4718_p12 }
  0x1f   :  { %p4721_p1 = pnand %p4720_p0, %p4714_p11 }
  0x21   :  { %4724 = shalt.err (!%p4721_p1)
}
  0x22   :  { %33 = dma.hbm_to_vmem [thread:$0]  %s5575_s1, 5120, %s4852_s24, [#allocation6], %s4777_s15, %s4777_s15, %s4778_s16  }
  0x23   :  { %s4779_s29 = smov [#allocation10]   ;;  %s4725_s17 = scalar_lea.hbm %s5579_s5, 6400 }
  0x24   :  { %s55_s30 = sshll.u32 %s4779_s29, 4  ;;  %p4726_p2 = scmp.ne.s32.totalorder %s5579_s5, %s4725_s17  ;;  %s56_s30 = int_to_ptr.vmem [resolvable:$true] %s55_s30 }
  0x25   :  { %p4729_p3 = scmp.lt.u32.totalorder %s4725_s17, %s5579_s5 }
  0x27   :  { %p4731_p4 = pnand %p4729_p3, %p4726_p2 }
  0x29   :  { %4734 = shalt.err (!%p4731_p4)
}
  0x2a   :  { %s4735_s23 = scalar_lea.vmem %s56_s30, 6400  ;;  %p4740_p6 = scmp.lt.s32.totalorder %s56_s30, %s56_s30 }
  0x2b   :  { %p4736_p5 = scmp.ne.s32.totalorder %s56_s30, %s4735_s23  ;;  %p4741_p7 = scmp.lt.s32.totalorder %s4735_s23, %s4735_s23 }
  0x2d   :  { %p4742_p8 = por %p4741_p7, %p4740_p6 }
  0x2f   :  { %p4743_p9 = pnand %p4742_p8, %p4736_p5 }
  0x31   :  { %4746 = shalt.err (!%p4743_p9)
}
  0x32   :  { %s4780_s1 = smov 128   ;;  %s4781_s24 = smov 8  }
  0x33   :  { %61 = dma.hbm_to_vmem [thread:$0]  %s5579_s5, 6400, %s56_s30, [#allocation9], %s4780_s1, %s4780_s1, %s4781_s24  }
  0x34   :  { %4769 = dma.done.wait [#allocation6], 5120  }
  0x35   :  { %4770 = vsyncadd [#allocation6], 4294962176 }
  0x36   :  { %4771 = dma.done.wait [#allocation9], 20480  }
  0x37   :  { %4772 = vsyncadd [#allocation9], 4294946816  ;;  %v4782_v0 = vmov 0.0   ;;  %v106_v1 = vld [vmem:[#allocation5 + $0x48] sm:$0xff]  ;;  %v108_v2 = vld [vmem:[#allocation5 + $0x58] sm:$0xff]  ;;  %vm113_vm0 = vcmask 261120  }
  0x38   :  { %184 = vmatprep.mubr.f32.mxu0 %v4782_v0  ;;  %642 = vmatprep.mubr.f32.mxu1 %v4782_v0  ;;  %v105_v3 = vld [vmem:[#allocation5 + $0x40] sm:$0xff]  ;;  %v4897_v4 = vpack.c.bf16 %v108_v2, %v106_v1  ;;  %v107_v5 = vld [vmem:[#allocation5 + $0x50] sm:$0xff]  ;;  %v110_v6 = vld [vmem:[#allocation5 + $0x68] sm:$0xff]  ;;  %vm83_vm1 = vcmask 687104   ;;  %vm1957_vm2 = vcmask 1043456   ;;  %vm999_vm3 = vcmask 686080  }
  0x39   :  { %v112_v7 = vld [vmem:[#allocation5 + $0x78] sm:$0xff]  ;;  %v4899_v8 = vpack.c.bf16 %v107_v5, %v105_v3  ;;  %v109_v10 = vld [vmem:[#allocation5 + $0x60] sm:$0xff]  ;;  %v111_v11 = vld [vmem:[#allocation5 + $0x70] sm:$0xff]  ;;  %84 = vst.msk [vmem:[#allocation2] sm:$0xff] %vm83_vm1, %v4782_v0  ;;  %vm88_vm4 = vcmask 654336   ;;  %vm2907_vm5 = vcmask 652288  }
  0x3a   :  { %v4901_v9 = vpack.c.bf16 %v112_v7, %v110_v6  ;;  %4066 = vmatprep.subr.bf16.mxu0 %v4897_v4  ;;  %4106 = vmatprep.subr.bf16.mxu1 %v4897_v4  ;;  %v94_v12 = vld [vmem:[#allocation5 + $0x8] sm:$0xff]  ;;  %v96_v13 = vld [vmem:[#allocation5 + $0x18] sm:$0xff]  ;;  %v4907_v14 = vpack.c.bf16 %v111_v11, %v109_v10  ;;  %v93_v16 = vld [vmem:[#allocation5] sm:$0xff]  ;;  %85 = vst.msk [vmem:[#allocation2 + $0x8] sm:$0xff] %vm83_vm1, %v4782_v0  ;;  %vm4784_vm6 = vmmov 0   ;;  %vm4785_vm7 = vmmov 1  }
  0x3b   :  { %4068 = vmatpush1.bf16.msra.mxu0 %v4899_v8  ;;  %4108 = vmatpush1.bf16.msra.mxu1 %v4899_v8  ;;  %v4911_v15 = vpack.c.bf16 %v96_v13, %v94_v12  ;;  %v95_v17 = vld [vmem:[#allocation5 + $0x10] sm:$0xff]  ;;  %v98_v18 = vld [vmem:[#allocation5 + $0x28] sm:$0xff]  ;;  %v100_v19 = vld [vmem:[#allocation5 + $0x38] sm:$0xff]  ;;  %86 = vst.msk [vmem:[#allocation3] sm:$0xff] %vm83_vm1, %v4782_v0  ;;  %vm3388_vm9 = vcmask 97280   ;;  %vm3488_vm10 = vcmask 982016  }
  0x3c   :  { %4070 = vmatprep.subr.bf16.mxu0 %v4901_v9  ;;  %4110 = vmatprep.subr.bf16.mxu1 %v4901_v9  ;;  %v3675_v20 = vld [vmem:[%s5574_s0 + $0x10] sm:$0xff]  ;;  %v4921_v21 = vld [vmem:[%s5574_s0 + $0x20] sm:$0xff]  ;;  %v4923_v22 = vpack.c.bf16 %v95_v17, %v93_v16  ;;  %v4927_v25 = vpack.c.bf16 %v100_v19, %v98_v18  ;;  %v285_v26 = vld [vmem:[#allocation5 + $0x88] sm:$0xff]  ;;  %87 = vst.msk [vmem:[#allocation3 + $0x8] sm:$0xff] %vm83_vm1, %v4782_v0  ;;  %s4786_s29 = smov [#allocation11]   ;;  %vm3657_vm11 = vcmask 74752  }
  0x3d   :  { %v97_v23 = vld [vmem:[#allocation5 + $0x20] sm:$0xff]  ;;  %v99_v24 = vld [vmem:[#allocation5 + $0x30] sm:$0xff]  ;;  %v287_v27 = vld [vmem:[#allocation5 + $0x98] sm:$0xff]  ;;  %89 = vst.msk [vmem:[#allocation4] sm:$0xff] %vm88_vm4, %v4782_v0  ;;  %s3665_s30 = sshll.u32 %s4786_s29, 4  ;;  %s3666_s30 = int_to_ptr.vmem [resolvable:$true] %s3665_s30 }
  0x3e   :  { %v3676_v28 = vld [vmem:[%s5574_s0 + $0x18] sm:$0x7f]  ;;  %v4940_v29 = vld [vmem:[%s5574_s0 + $0x28] sm:$0x7f]  ;;  %v4942_v30 = vpack.c.bf16 %v99_v24, %v97_v23  ;;  %v284_v31 = vld [vmem:[#allocation5 + $0x80] sm:$0xff]  ;;  %v4948_v33 = vpack.c.bf16 %v287_v27, %v285_v26  ;;  %90 = vst.msk [vmem:[#allocation4 + $0x8] sm:$0xff] %vm88_vm4, %v4782_v0  ;;  %p4752_p11 = scmp.lt.s32.totalorder %s3666_s30, %s3666_s30 }
  0x3f   :  { %4072 = vmatpush1.bf16.msra.mxu0 %v4907_v14  ;;  %4112 = vmatpush1.bf16.msra.mxu1 %v4907_v14  ;;  %v286_v32 = vld [vmem:[#allocation5 + $0x90] sm:$0xff]  ;;  %v289_v34 = vld [vmem:[#allocation5 + $0xa8] sm:$0xff]  ;;  %v291_v35 = vld [vmem:[#allocation5 + $0xb8] sm:$0xff] }
  0x40   :  { %4074 = vmatprep.subr.bf16.mxu0 %v4911_v15  ;;  %4114 = vmatprep.subr.bf16.mxu1 %v4911_v15  ;;  %v91_v36 = vld [vmem:[%s5574_s0] sm:$0xff]  ;;  %v4958_v37 = vpack.c.bf16 %v286_v32, %v284_v31  ;;  %v288_v38 = vld [vmem:[#allocation5 + $0xa0] sm:$0xff]  ;;  %v4964_v40 = vpack.c.bf16 %v291_v35, %v289_v34  ;;  %v384_v41 = vld [vmem:[#allocation5 + $0xc8] sm:$0xff] }
  0x41   :  { %v290_v39 = vld [vmem:[#allocation5 + $0xb0] sm:$0xff]  ;;  %v386_v42 = vld [vmem:[#allocation5 + $0xd8] sm:$0xff]  ;;  %v383_v45 = vld [vmem:[#allocation5 + $0xc0] sm:$0xff] }
  0x42   :  { %3677 = vmatmul.mubr.msk.f32.vlgmr.msra.gmra.mrb[0].mxu0 %vm113_vm0, %v3675_v20  ;;  %3691 = vmatmul.mubr.msk.f32.vlgmr.msra.gmra.mrb[0].mxu1 %vm113_vm0, %v4921_v21  ;;  %v92_v43 = vld [vmem:[%s5574_s0 + $0x8] sm:$0x7f]  ;;  %v4973_v44 = vpack.c.bf16 %v290_v39, %v288_v38  ;;  %v385_v46 = vld [vmem:[#allocation5 + $0xd0] sm:$0xff]  ;;  %v4979_v47 = vpack.c.bf16 %v386_v42, %v384_v41  ;;  %v388_v48 = vld [vmem:[#allocation5 + $0xe8] sm:$0xff] }
  0x43   :  { %4076 = vmatpush1.bf16.msra.mxu0 %v4923_v22  ;;  %4116 = vmatpush1.bf16.msra.mxu1 %v4923_v22  ;;  %v390_v49 = vld [vmem:[#allocation5 + $0xf8] sm:$0xff]  ;;  %v4988_v50 = vld [vmem:[%s5574_s0 + $0x30] sm:$0xff]  ;;  %v4990_v51 = vpack.c.bf16 %v385_v46, %v383_v45  ;;  %v389_v53 = vld [vmem:[#allocation5 + $0xf0] sm:$0xff] }
  0x44   :  { %190 = vmatprep.mubr.f32.mxu0 %v4782_v0  ;;  %648 = vmatprep.mubr.f32.mxu1 %v4782_v0  ;;  %v387_v52 = vld [vmem:[#allocation5 + $0xe0] sm:$0xff]  ;;  %v4996_v54 = vpack.c.bf16 %v390_v49, %v388_v48  ;;  %v482_v55 = vld [vmem:[#allocation5 + $0x108] sm:$0xff]  ;;  %v484_v56 = vld [vmem:[#allocation5 + $0x118] sm:$0xff] }
  0x45   :  { %4078 = vmatprep.subr.bf16.mxu0 %v4927_v25  ;;  %4118 = vmatprep.subr.bf16.mxu1 %v4927_v25  ;;  %v3686_v57 = vld [vmem:[%s5574_s0 + $0x38] sm:$0x7f]  ;;  %v5007_v58 = vpack.c.bf16 %v389_v53, %v387_v52  ;;  %v481_v59 = vld [vmem:[#allocation5 + $0x100] sm:$0xff]  ;;  %v483_v60 = vld [vmem:[#allocation5 + $0x110] sm:$0xff]  ;;  %v5013_v61 = vpack.c.bf16 %v484_v56, %v482_v55 }
  0x46   :  { %3678 = vmatmul.mubr.msk.f32.gmra.mrb[2].mxu0 %vm113_vm0, %v3676_v28  ;;  %3692 = vmatmul.mubr.msk.f32.gmra.mrb[2].mxu1 %vm113_vm0, %v4940_v29  ;;  %v486_v62 = vld [vmem:[#allocation5 + $0x128] sm:$0xff]  ;;  %v488_v63 = vld [vmem:[#allocation5 + $0x138] sm:$0xff]  ;;  %v5025_v2 = vpack.c.bf16 %v483_v60, %v481_v59  ;;  %v485_v3 = vld [vmem:[#allocation5 + $0x120] sm:$0xff] }
  0x47   :  { %4080 = vmatpush1.bf16.msra.mxu0 %v4942_v30  ;;  %4120 = vmatpush1.bf16.msra.mxu1 %v4942_v30  ;;  %v5023_v1 = vld [vmem:[%s5574_s0 + $0x1] sm:$0xff]  ;;  %v5031_v6 = vpack.c.bf16 %v488_v63, %v486_v62  ;;  %v479_v7 = vld [vmem:[%s5574_s0 + $0x9] sm:$0x7f]  ;;  %v5055_v11 = vld [vmem:[%s5574_s0 + $0x11] sm:$0xff] }
  0x48   :  { %267 = vmatprep.mubr.f32.mxu0 %v4782_v0  ;;  %719 = vmatprep.mubr.f32.mxu1 %v4782_v0  ;;  %v487_v5 = vld [vmem:[#allocation5 + $0x130] sm:$0xff]  ;;  %v3700_v12 = vld [vmem:[%s5574_s0 + $0x19] sm:$0x7f]  ;;  %v3730_v16 = vld [vmem:[%s5574_s0 + $0x31] sm:$0xff] }
  0x49   :  { %4082 = vmatprep.subr.bf16.mxu0 %v4948_v33  ;;  %4122 = vmatprep.subr.bf16.mxu1 %v4948_v33  ;;  %v5042_v10 = vpack.c.bf16 %v487_v5, %v485_v3  ;;  %v3715_v13 = vld [vmem:[%s5574_s0 + $0x19] sm:$0x7f]  ;;  %v1930_v18 = vld [vmem:[#allocation8 + $0xb8] sm:$0xff]  ;;  %v1933_v27 = vld [vmem:[#allocation8 + $0xd0] sm:$0xff] }
  0x4a   :  { %3679 = vmatmul.mubr.msk.f32.vlgmr.msra.gmra.mrb[0].mxu0 %vm113_vm0, %v91_v36  ;;  %3693 = vmatmul.mubr.msk.f32.vlgmr.msra.gmra.mrb[0].mxu1 %vm113_vm0, %v3675_v20  ;;  %v3731_v17 = vld [vmem:[%s5574_s0 + $0x39] sm:$0x7f]  ;;  %v1934_v24 = vld [vmem:[#allocation8 + $0xd8] sm:$0xff]  ;;  %v1939_v34 = vld [vmem:[#allocation8 + $0x100] sm:$0xff] }
  0x4b   :  { %4084 = vmatpush1.bf16.msra.mxu0 %v4958_v37  ;;  %4124 = vmatpush1.bf16.msra.mxu1 %v4958_v37  ;;  %v1932_v19 = vld [vmem:[#allocation8 + $0xc8] sm:$0xff]  ;;  %v1942_v36 = vld [vmem:[#allocation8 + $0x118] sm:$0xff]  ;;  %v1941_v39 = vld [vmem:[#allocation8 + $0x110] sm:$0xff] }
  0x4c   :  { %273 = vmatprep.mubr.f32.mxu0 %v4782_v0  ;;  %725 = vmatprep.mubr.f32.mxu1 %v4782_v0  ;;  %v4225_v20 = vpack.c.bf16 %v1932_v19, %v1930_v18  ;;  %v1940_v31 = vld [vmem:[#allocation8 + $0x108] sm:$0xff]  ;;  %v1946_v42 = vld [vmem:[#allocation8 + $0x138] sm:$0xff]  ;;  %v1945_v45 = vld [vmem:[#allocation8 + $0x130] sm:$0xff] }
  0x4d   :  { %4086 = vmatprep.subr.bf16.mxu0 %v4964_v40  ;;  %4126 = vmatprep.subr.bf16.mxu1 %v4964_v40  ;;  %v1947_v46 = vld [vmem:[#allocation8 + $0x140] sm:$0xff]  ;;  %v1950_v48 = vld [vmem:[#allocation8 + $0x158] sm:$0xf]  ;;  %v1949_v49 = vld [vmem:[#allocation8 + $0x150] sm:$0xf] }
  0x4e   :  { %3680 = vmatmul.mubr.msk.f32.gmra.mrb[2].mxu0 %vm113_vm0, %v92_v43  ;;  %3694 = vmatmul.mubr.msk.f32.gmra.mrb[2].mxu1 %vm113_vm0, %v3676_v28  ;;  %v1935_v28 = vld [vmem:[#allocation8 + $0xe0] sm:$0xff]  ;;  %v1948_v43 = vld [vmem:[#allocation8 + $0x148] sm:$0xff]  ;;  %v5198_v59 = vld [vmem:[%s5576_s2] ss:$0 sm:$0xff] }
  0x4f   :  { %4088 = vmatpush1.bf16.msra.mxu0 %v4973_v44  ;;  %4128 = vmatpush1.bf16.msra.mxu1 %v4973_v44  ;;  %v1913_v18 = vld [vmem:[#allocation8 + $0x48] sm:$0xff]  ;;  %v1915_v19 = vld [vmem:[#allocation8 + $0x58] sm:$0xff]  ;;  %vm4527_vm8 = vmpackc.low %vm1957_vm2, %vm4785_vm7 }
  0x50   :  { %362 = vmatprep.mubr.f32.mxu0 %v4782_v0  ;;  %796 = vmatprep.mubr.f32.mxu1 %v4782_v0 }
  0x51   :  { %4090 = vmatprep.subr.bf16.mxu0 %v4979_v47  ;;  %4130 = vmatprep.subr.bf16.mxu1 %v4979_v47 }
  0x52   :  { %3683 = vmatmul.mubr.msk.f32.vlgmr.msra.gmra.mrb[0].mxu0 %vm113_vm0, %v4921_v21  ;;  %3695 = vmatmul.mubr.msk.f32.vlgmr.msra.gmra.mrb[0].mxu1 %vm113_vm0, %v4988_v50 }
  0x53   :  { %4092 = vmatpush1.bf16.msra.mxu0 %v4990_v51  ;;  %4132 = vmatpush1.bf16.msra.mxu1 %v4990_v51 }
  0x54   :  { %368 = vmatprep.mubr.f32.mxu0 %v4782_v0  ;;  %802 = vmatprep.mubr.f32.mxu1 %v4782_v0 }
  0x55   :  { %4094 = vmatprep.subr.bf16.mxu0 %v4996_v54  ;;  %4134 = vmatprep.subr.bf16.mxu1 %v4996_v54 }
  0x56   :  { %3684 = vmatmul.mubr.msk.f32.gmra.mrb[2].mxu0 %vm113_vm0, %v4940_v29  ;;  %3696 = vmatmul.mubr.msk.f32.gmra.mrb[2].mxu1 %vm113_vm0, %v3686_v57  ;;  %v4231_v29 = vpack.c.bf16 %v1935_v28, %v1933_v27 }
  0x57   :  { %4096 = vmatpush1.bf16.msra.mxu0 %v5007_v58  ;;  %4136 = vmatpush1.bf16.msra.mxu1 %v5007_v58 }
  0x58   :  { %461 = vmatprep.mubr.f32.mxu0 %v4782_v0  ;;  %877 = vmatprep.mubr.f32.mxu1 %v4782_v0 }
  0x59   :  { %4098 = vmatprep.subr.bf16.mxu0 %v5013_v61  ;;  %4138 = vmatprep.subr.bf16.mxu1 %v5013_v61 }
  0x5a   :  { %3687 = vmatmul.mubr.msk.f32.vlgmr.msra.gmra.mrb[0].mxu0 %vm113_vm0, %v4988_v50  ;;  %3697 = vmatmul.mubr.msk.f32.vlgmr.msra.gmra.mrb[0].mxu1 %vm113_vm0, %v5023_v1 }
  0x5b   :  { %4100 = vmatpush1.bf16.msra.mxu0 %v5025_v2  ;;  %4140 = vmatpush1.bf16.msra.mxu1 %v5025_v2 }
  0x5c   :  { %467 = vmatprep.mubr.f32.mxu0 %v4782_v0  ;;  %883 = vmatprep.mubr.f32.mxu1 %v4782_v0 }
  0x5d   :  { %4102 = vmatprep.subr.bf16.mxu0 %v5031_v6  ;;  %4142 = vmatprep.subr.bf16.mxu1 %v5031_v6 }
  0x5e   :  { %3688 = vmatmul.mubr.msk.f32.gmra.mrb[2].mxu0 %vm113_vm0, %v3686_v57  ;;  %3698 = vmatmul.mubr.msk.f32.gmra.mrb[2].mxu1 %vm113_vm0, %v479_v7 }
  0x5f   :  { %4104 = vmatpush1.bf16.msra.mxu0 %v5042_v10  ;;  %4144 = vmatpush1.bf16.msra.mxu1 %v5042_v10 }
  0x60   :  { %559 = vmatprep.mubr.f32.mxu0 %v4782_v0  ;;  %966 = vmatprep.mubr.f32.mxu1 %v4782_v0 }
  0x61   :  { %4146 = vmatprep.subr.bf16.mxu0 %v4897_v4  ;;  %4186 = vmatprep.subr.bf16.mxu1 %v4897_v4  ;;  %v3707_v4 = vld [vmem:[%s5574_s0 + $0x38] sm:$0x7f] }
  0x62   :  { %3689 = vmatmul.mubr.msk.f32.vlgmr.msra.gmra.mrb[0].mxu0 %vm113_vm0, %v5023_v1  ;;  %3701 = vmatmul.mubr.msk.f32.vlgmr.msra.gmra.mrb[0].mxu1 %vm113_vm0, %v5055_v11 }
  0x63   :  { %4148 = vmatpush1.bf16.msra.mxu0 %v4899_v8  ;;  %4188 = vmatpush1.bf16.msra.mxu1 %v4899_v8  ;;  %v1188_v8 = vld [vmem:[%s5574_s0 + $0x9] sm:$0x7f] }
  0x64   :  { %565 = vmatprep.mubr.f32.mxu0 %v4782_v0  ;;  %972 = vmatprep.mubr.f32.mxu1 %v4782_v0 }
  0x65   :  { %4150 = vmatprep.subr.bf16.mxu0 %v4901_v9  ;;  %4190 = vmatprep.subr.bf16.mxu1 %v4901_v9  ;;  %v3705_v9 = vld [vmem:[%s5574_s0 + $0x28] sm:$0x7f] }
  0x66   :  { %3690 = vmatmul.mubr.msk.f32.gmra.mrb[2].mxu0 %vm113_vm0, %v479_v7  ;;  %3702 = vmatmul.mubr.msk.f32.gmra.mrb[2].mxu1 %vm113_vm0, %v3700_v12  ;;  %v1904_v12 = vld [vmem:[#allocation8] sm:$0xff] }
  0x67   :  { %4152 = vmatpush1.bf16.msra.mxu0 %v4907_v14  ;;  %4192 = vmatpush1.bf16.msra.mxu1 %v4907_v14  ;;  %v3718_v14 = vld [vmem:[%s5574_s0 + $0x21] sm:$0xff] }
  0x68   :  { %1091 = vmatprep.mubr.f32.mxu0 %v4782_v0  ;;  %1544 = vmatprep.mubr.f32.mxu1 %v4782_v0 }
  0x69   :  { %4154 = vmatprep.subr.bf16.mxu0 %v4911_v15  ;;  %4194 = vmatprep.subr.bf16.mxu1 %v4911_v15  ;;  %v3719_v15 = vld [vmem:[%s5574_s0 + $0x29] sm:$0x7f] }
  0x6a   :  { %3708 = vmatmul.mubr.msk.f32.vlgmr.msra.gmra.mrb[4].mxu0 %vm113_vm0, %v4988_v50  ;;  %3722 = vmatmul.mubr.msk.f32.vlgmr.msra.gmra.mrb[4].mxu1 %vm113_vm0, %v5023_v1 }
  0x6b   :  { %4156 = vmatpush1.bf16.msra.mxu0 %v4923_v22  ;;  %4196 = vmatpush1.bf16.msra.mxu1 %v4923_v22  ;;  %v1931_v22 = vld [vmem:[#allocation8 + $0xc0] sm:$0xff] }
  0x6c   :  { %1097 = vmatprep.mubr.f32.mxu0 %v4782_v0  ;;  %1550 = vmatprep.mubr.f32.mxu1 %v4782_v0 }
  0x6d   :  { %4158 = vmatprep.subr.bf16.mxu0 %v4927_v25  ;;  %4198 = vmatprep.subr.bf16.mxu1 %v4927_v25  ;;  %v1936_v25 = vld [vmem:[#allocation8 + $0xe8] sm:$0xff] }
  0x6e   :  { %3709 = vmatmul.mubr.msk.f32.gmra.mrb[6].mxu0 %vm113_vm0, %v3707_v4  ;;  %3723 = vmatmul.mubr.msk.f32.gmra.mrb[6].mxu1 %vm113_vm0, %v1188_v8  ;;  %v4229_v26 = vpack.c.bf16 %v1936_v25, %v1934_v24  ;;  %v1917_v25 = vld [vmem:[#allocation8 + $0x68] sm:$0xff] }
  0x6f   :  { %4160 = vmatpush1.bf16.msra.mxu0 %v4942_v30  ;;  %4200 = vmatpush1.bf16.msra.mxu1 %v4942_v30  ;;  %v1938_v30 = vld [vmem:[#allocation8 + $0xf8] sm:$0xff] }
  0x70   :  { %1174 = vmatprep.mubr.f32.mxu0 %v4782_v0  ;;  %1621 = vmatprep.mubr.f32.mxu1 %v4782_v0  ;;  %v4233_v32 = vpack.c.bf16 %v1940_v31, %v1938_v30  ;;  %v1918_v30 = vld [vmem:[#allocation8 + $0x70] sm:$0xff]  ;;  %v1921_v31 = vld [vmem:[#allocation8 + $0x88] sm:$0xff] }
  0x71   :  { %4162 = vmatprep.subr.bf16.mxu0 %v4948_v33  ;;  %4202 = vmatprep.subr.bf16.mxu1 %v4948_v33  ;;  %v1937_v33 = vld [vmem:[#allocation8 + $0xf0] sm:$0xff] }
  0x72   :  { %3710 = vmatmul.mubr.msk.f32.vlgmr.msra.gmra.mrb[4].mxu0 %vm113_vm0, %v4921_v21  ;;  %3724 = vmatmul.mubr.msk.f32.vlgmr.msra.gmra.mrb[4].mxu1 %vm113_vm0, %v4988_v50  ;;  %v1929_v21 = vld [vmem:[#allocation8 + $0xb0] sm:$0xff]  ;;  %v4235_v35 = vpack.c.bf16 %v1939_v34, %v1937_v33  ;;  %v1905_v50 = vld [vmem:[#allocation8 + $0x8] sm:$0xff] }
  0x73   :  { %4164 = vmatpush1.bf16.msra.mxu0 %v4958_v37  ;;  %4204 = vmatpush1.bf16.msra.mxu1 %v4958_v37  ;;  %v4227_v23 = vpack.c.bf16 %v1931_v22, %v1929_v21  ;;  %v1944_v37 = vld [vmem:[#allocation8 + $0x128] sm:$0xff]  ;;  %v5217_v21 = vpack.c.bf16 %v1915_v19, %v1913_v18  ;;  %v1912_v22 = vld [vmem:[#allocation8 + $0x40] sm:$0xff]  ;;  %v2148_v18 = vld [vmem:[#allocation8 + $0x1d8] sm:$0xff] }
  0x74   :  { %1180 = vmatprep.mubr.f32.mxu0 %v4782_v0  ;;  %1627 = vmatprep.mubr.f32.mxu1 %v4782_v0  ;;  %v4237_v38 = vpack.c.bf16 %v1944_v37, %v1942_v36  ;;  %v1922_v36 = vld [vmem:[#allocation8 + $0x90] sm:$0xff]  ;;  %v2145_v19 = vld [vmem:[#allocation8 + $0x1c0] sm:$0xff] }
  0x75   :  { %4166 = vmatprep.subr.bf16.mxu0 %v4964_v40  ;;  %4206 = vmatprep.subr.bf16.mxu1 %v4964_v40  ;;  %v1943_v40 = vld [vmem:[#allocation8 + $0x120] sm:$0xff] }
  0x76   :  { %3711 = vmatmul.mubr.msk.f32.gmra.mrb[6].mxu0 %vm113_vm0, %v3705_v9  ;;  %3725 = vmatmul.mubr.msk.f32.gmra.mrb[6].mxu1 %vm113_vm0, %v3707_v4  ;;  %v4239_v41 = vpack.c.bf16 %v1943_v40, %v1941_v39  ;;  %v1906_v4 = vld [vmem:[#allocation8 + $0x10] sm:$0xff]  ;;  %v1911_v9 = vld [vmem:[#allocation8 + $0x38] sm:$0xff]  ;;  %v2134_v39 = vld [vmem:[#allocation8 + $0x168] sm:$0xff] }
  0x77   :  { %4168 = vmatpush1.bf16.msra.mxu0 %v4973_v44  ;;  %4208 = vmatpush1.bf16.msra.mxu1 %v4973_v44  ;;  %v4241_v44 = vpack.c.bf16 %v1948_v43, %v1946_v42  ;;  %v2136_v40 = vld [vmem:[#allocation8 + $0x178] sm:$0xff]  ;;  %v5245_v43 = vld [vmem:[#allocation8 + $0xa0] sm:$0xf] }
  0x78   :  { %1267 = vmatprep.mubr.f32.mxu0 %v4782_v0  ;;  %1698 = vmatprep.mubr.f32.mxu1 %v4782_v0 }
  0x79   :  { %4170 = vmatprep.subr.bf16.mxu0 %v4979_v47  ;;  %4210 = vmatprep.subr.bf16.mxu1 %v4979_v47  ;;  %v4243_v47 = vpack.c.bf16 %v1947_v46, %v1945_v45 }
  0x7a   :  { %3712 = vmatmul.mubr.msk.f32.vlgmr.msra.gmra.mrb[4].mxu0 %vm113_vm0, %v5023_v1  ;;  %3726 = vmatmul.mubr.msk.f32.vlgmr.msra.gmra.mrb[4].mxu1 %vm113_vm0, %v5055_v11 }
  0x7b   :  { %4172 = vmatpush1.bf16.msra.mxu0 %v4990_v51  ;;  %4212 = vmatpush1.bf16.msra.mxu1 %v4990_v51  ;;  %v1907_v51 = vld [vmem:[#allocation8 + $0x18] sm:$0xff] }
  0x7c   :  { %1273 = vmatprep.mubr.f32.mxu0 %v4782_v0  ;;  %1704 = vmatprep.mubr.f32.mxu1 %v4782_v0  ;;  %v4245_v52 = vpack.c.bf16 %v1907_v51, %v1905_v50 }
  0x7d   :  { %4174 = vmatprep.subr.bf16.mxu0 %v4996_v54  ;;  %4214 = vmatprep.subr.bf16.mxu1 %v4996_v54 }
  0x7e   :  { %3713 = vmatmul.mubr.msk.f32.gmra.mrb[6].mxu0 %vm113_vm0, %v1188_v8  ;;  %3727 = vmatmul.mubr.msk.f32.gmra.mrb[6].mxu1 %vm113_vm0, %v3715_v13  ;;  %v1909_v8 = vld [vmem:[#allocation8 + $0x28] sm:$0xff] }
  0x7f   :  { %4176 = vmatpush1.bf16.msra.mxu0 %v5007_v58  ;;  %4216 = vmatpush1.bf16.msra.mxu1 %v5007_v58 }
  0x80   :  { %1364 = vmatprep.mubr.f32.mxu0 %v4782_v0  ;;  %1779 = vmatprep.mubr.f32.mxu1 %v4782_v0 }
  0x81   :  { %4178 = vmatprep.subr.bf16.mxu0 %v5013_v61  ;;  %4218 = vmatprep.subr.bf16.mxu1 %v5013_v61 }
  0x82   :  { %3716 = vmatmul.mubr.msk.f32.vlgmr.msra.gmra.mrb[4].mxu0 %vm113_vm0, %v5055_v11  ;;  %3728 = vmatmul.mubr.msk.f32.vlgmr.msra.gmra.mrb[4].mxu1 %vm113_vm0, %v3718_v14 }
  0x83   :  { %4180 = vmatpush1.bf16.msra.mxu0 %v5025_v2  ;;  %4220 = vmatpush1.bf16.msra.mxu1 %v5025_v2 }
  0x84   :  { %1370 = vmatprep.mubr.f32.mxu0 %v4782_v0  ;;  %1785 = vmatprep.mubr.f32.mxu1 %v4782_v0 }
  0x85   :  { %4182 = vmatprep.subr.bf16.mxu0 %v5031_v6  ;;  %4222 = vmatprep.subr.bf16.mxu1 %v5031_v6 }
  0x86   :  { %3717 = vmatmul.mubr.msk.f32.gmra.mrb[6].mxu0 %vm113_vm0, %v3715_v13  ;;  %3729 = vmatmul.mubr.msk.f32.gmra.mrb[6].mxu1 %vm113_vm0, %v3719_v15  ;;  %v5204_v13 = vpack.c.bf16 %v1906_v4, %v1904_v12  ;;  %v2144_v12 = vld [vmem:[#allocation8 + $0x1b8] sm:$0xff] }
  0x87   :  { %4184 = vmatpush1.bf16.msra.mxu0 %v5042_v10  ;;  %4224 = vmatpush1.bf16.msra.mxu1 %v5042_v10 }
  0x88   :  { %1461 = vmatprep.mubr.f32.mxu0 %v4782_v0  ;;  %1868 = vmatprep.mubr.f32.mxu1 %v4782_v0 }
  0x89   :  { %4326 = vmatprep.subr.bf16.mxu1 %v4225_v20  ;;  %4226 = vmatprep.subr.bf16.mxu0 %v4225_v20 }
  0x8a   :  { %3720 = vmatmul.mubr.msk.f32.vlgmr.msra.gmra.mrb[4].mxu0 %vm113_vm0, %v3718_v14  ;;  %3732 = vmatmul.mubr.msk.f32.vlgmr.msra.gmra.mrb[4].mxu1 %vm113_vm0, %v3730_v16  ;;  %v5206_v14 = vpack.c.bf16 %v1911_v9, %v1909_v8  ;;  %v1910_v16 = vld [vmem:[#allocation8 + $0x30] sm:$0xff]  ;;  %v2141_v8 = vld [vmem:[#allocation8 + $0x1a0] sm:$0xff] }
  0x8b   :  { %1467 = vmatprep.mubr.f32.mxu0 %v4782_v0  ;;  %1874 = vmatprep.mubr.f32.mxu1 %v4782_v0  ;;  %v2143_v9 = vld [vmem:[#allocation8 + $0x1b0] sm:$0xff] }
  0x8c   :  { %4328 = vmatpush1.bf16.msra.mxu1 %v4227_v23  ;;  %4228 = vmatpush1.bf16.msra.mxu0 %v4227_v23  ;;  %v1914_v23 = vld [vmem:[#allocation8 + $0x50] sm:$0xff] }
  0x8d   :  { %4330 = vmatprep.subr.bf16.mxu1 %v4229_v26  ;;  %4230 = vmatprep.subr.bf16.mxu0 %v4229_v26  ;;  %v1919_v26 = vld [vmem:[#allocation8 + $0x78] sm:$0xff]  ;;  %v5224_v27 = vpack.c.bf16 %v1914_v23, %v1912_v22  ;;  %v2147_v22 = vld [vmem:[#allocation8 + $0x1d0] sm:$0xff]  ;;  %v2150_v23 = vld [vmem:[#allocation8 + $0x1e8] sm:$0xff] }
  0x8e   :  { %3721 = vmatmul.mubr.msk.f32.gmra.mrb[6].mxu0 %vm113_vm0, %v3719_v15  ;;  %3733 = vmatmul.mubr.msk.f32.gmra.mrb[6].mxu1 %vm113_vm0, %v3731_v17  ;;  %v1908_v15 = vld [vmem:[#allocation8 + $0x20] sm:$0xff]  ;;  %v5228_v28 = vpack.c.bf16 %v1919_v26, %v1917_v25  ;;  %v2152_v25 = vld [vmem:[#allocation8 + $0x1f8] sm:$0xff] }
  0x8f   :  { %2550 = vmatprep.mubr.f32.mxu1 %v4782_v0  ;;  %2028 = vmatprep.mubr.f32.mxu0 %v4782_v0  ;;  %v5214_v20 = vpack.c.bf16 %v1910_v16, %v1908_v15  ;;  %v2146_v16 = vld [vmem:[#allocation8 + $0x1c8] sm:$0xff]  ;;  %v2149_v26 = vld [vmem:[#allocation8 + $0x1e0] sm:$0xff] }
  0x90   :  { %4332 = vmatpush1.bf16.msra.mxu1 %v4231_v29  ;;  %4232 = vmatpush1.bf16.msra.mxu0 %v4231_v29  ;;  %v1916_v29 = vld [vmem:[#allocation8 + $0x60] sm:$0xff] }
  0x91   :  { %4334 = vmatprep.subr.bf16.mxu1 %v4233_v32  ;;  %4234 = vmatprep.subr.bf16.mxu0 %v4233_v32  ;;  %v1923_v32 = vld [vmem:[#allocation8 + $0x98] sm:$0xff]  ;;  %v5231_v33 = vpack.c.bf16 %v1918_v30, %v1916_v29  ;;  %v2151_v29 = vld [vmem:[#allocation8 + $0x1f0] sm:$0xff] }
  0x92   :  { %v5234_v34 = vpack.c.bf16 %v1923_v32, %v1921_v31  ;;  %v5294_v30 = vpack.c.bf16 %v2151_v29, %v2149_v26  ;;  %v2252_v31 = vld [vmem:[#allocation8 + $0x218] sm:$0xff]  ;;  %v2251_v32 = vld [vmem:[#allocation8 + $0x210] sm:$0xff] }
  0x94   :  { %4336 = vmatpush1.bf16.msra.mxu1 %v4235_v35  ;;  %4236 = vmatpush1.bf16.msra.mxu0 %v4235_v35  ;;  %v1920_v35 = vld [vmem:[#allocation8 + $0x80] sm:$0xff] }
  0x95   :  { %4338 = vmatprep.subr.bf16.mxu1 %v4237_v38  ;;  %4238 = vmatprep.subr.bf16.mxu0 %v4237_v38  ;;  %v5237_v37 = vpack.c.bf16 %v1922_v36, %v1920_v35  ;;  %v5240_v38 = vld [vmem:[#allocation8 + $0xa8] sm:$0xf]  ;;  %v2253_v35 = vld [vmem:[#allocation8 + $0x220] sm:$0xff] }
  0x96   :  { %v5310_v36 = vpack.c.bf16 %v2253_v35, %v2251_v32  ;;  %v2385_v35 = vld [vmem:[#allocation8 + $0x340] sm:$0xff] }
  0x98   :  { %4340 = vmatpush1.bf16.msra.mxu1 %v4239_v41  ;;  %4240 = vmatpush1.bf16.msra.mxu0 %v4239_v41 }
  0x99   :  { %4342 = vmatprep.subr.bf16.mxu1 %v4241_v44  ;;  %4242 = vmatprep.subr.bf16.mxu0 %v4241_v44  ;;  %v5247_v44 = vpack.c.bf16 %v2136_v40, %v2134_v39  ;;  %v2256_v39 = vld [vmem:[#allocation8 + $0x238] sm:$0xff]  ;;  %v2258_v40 = vld [vmem:[#allocation8 + $0x248] sm:$0xff] }
  0x9c   :  { %4344 = vmatpush1.bf16.msra.mxu1 %v4243_v47  ;;  %4244 = vmatpush1.bf16.msra.mxu0 %v4243_v47 }
  0x9d   :  { %3755 = vmatprep.subr.msk.mxu1 %vm1957_vm2, %v1950_v48  ;;  %3735 = vmatprep.subr.msk.mxu0 %vm1957_vm2, %v1950_v48 }
  0xa0   :  { %3756 = vmatpush1.msk.msra.mxu1 %vm1957_vm2, %v1949_v49  ;;  %3736 = vmatpush1.msk.msra.mxu0 %vm1957_vm2, %v1949_v49 }
  0xa1   :  { %4346 = vmatprep.subr.bf16.mxu1 %v4245_v52  ;;  %4246 = vmatprep.subr.bf16.mxu0 %v4245_v52 }
 0x135   :  { %v561_v53 = vpop.f32.mrb[0].mxu0  ;;  %v968_v54 = vpop.f32.mrb[0].mxu1 }
 0x136   :  { %v563_v55 = vpop.f32.mrb[1].mxu0  ;;  %v970_v56 = vpop.f32.mrb[1].mxu1 }
 0x137   :  { %v576_v57 = vmax.f32 %v561_v53, %v563_v55  ;;  %v983_v58 = vmax.f32 %v968_v54, %v970_v56 }
 0x139   :  { %v985_v60 = vmax.f32 %v576_v57, %v983_v58  ;;  %v567_v61 = vpop.f32.mrb[2].mxu0  ;;  %v974_v62 = vpop.f32.mrb[2].mxu1 }
 0x13a   :  { %v569_v63 = vpop.f32.mrb[3].mxu0  ;;  %v976_v1 = vpop.f32.mrb[3].mxu1 }
 0x13b   :  { %v994_v2 = vadd.f32 %v5198_v59, %v985_v60  ;;  %v577_v3 = vmax.f32 %v567_v61, %v569_v63  ;;  %v984_v5 = vmax.f32 %v974_v62, %v976_v1  ;;  %v2133_v62 = vld [vmem:[#allocation8 + $0x160] sm:$0xff]  ;;  %v2135_v63 = vld [vmem:[#allocation8 + $0x170] sm:$0xff]  ;;  %v2138_v1 = vld [vmem:[#allocation8 + $0x188] sm:$0xff] }
 0x13d   :  { %v996_v6 = vmax.f32 %v994_v2, 0.0  ;;  %v986_v7 = vmax.f32 %v577_v3, %v984_v5  ;;  %v2140_v2 = vld [vmem:[#allocation8 + $0x198] sm:$0xff]  ;;  %v5256_v3 = vpack.c.bf16 %v2135_v63, %v2133_v62  ;;  %v2137_v5 = vld [vmem:[#allocation8 + $0x180] sm:$0xff]  ;;  %v2267_v63 = vld [vmem:[#allocation8 + $0x290] sm:$0xff] }
 0x13f   :  { %998 = vst.msk [vmem:[#allocation2] sm:$0xff] %vm83_vm1, %v996_v6  ;;  %v995_v10 = vadd.f32 %v5198_v59, %v986_v7  ;;  %v2139_v6 = vld [vmem:[#allocation8 + $0x190] sm:$0xff] }
 0x141   :  { %v997_v11 = vmax.f32 %v995_v10, 0.0  ;;  %v5258_v10 = vpack.c.bf16 %v2140_v2, %v2138_v1  ;;  %v2269_v1 = vld [vmem:[#allocation8 + $0x2a0] sm:$0xff] }
 0x142   :  { %v5360_v2 = vpack.c.bf16 %v2269_v1, %v2267_v63  ;;  %v2930_v63 = vld [vmem:[#allocation10 + $0x88] sm:$0xff] }
 0x143   :  { %1000 = vst.msk [vmem:[#allocation2 + $0x8] sm:$0x7f] %vm999_vm3, %v997_v11  ;;  %v2142_v11 = vld [vmem:[#allocation8 + $0x1a8] sm:$0xff] }
 0x144   :  { %v5268_v4 = vpack.c.bf16 %v2144_v12, %v2142_v11  ;;  %v5372_v11 = vld [vmem:[#allocation8 + $0x2b0] sm:$0xf] }
 0x14a   :  { %v5208_v17 = vld [vmem:[#allocation2 + $0x1] sm:$0xff]  ;;  %v5219_v24 = vld [vmem:[#allocation2 + $0x9] sm:$0x3f] }
 0x14b   :  { %3757 = vmatmul.mubr.msk.f32.vlgmr.msra.gmra.mrb[8].mxu1 %vm83_vm1, %v5208_v17 }
 0x14c   :  { %2556 = vmatprep.mubr.f32.mxu1 %v4782_v0  ;;  %4348 = vmatpush1.bf16.msra.mxu1 %v5204_v13 }
 0x14d   :  { %4350 = vmatprep.subr.bf16.mxu1 %v5206_v14 }
 0x14f   :  { %3758 = vmatmul.mubr.msk.f32.gmra.mrb[10].mxu1 %vm83_vm1, %v5219_v24 }
 0x150   :  { %4352 = vmatpush1.bf16.msra.mxu1 %v5214_v20  ;;  %2627 = vmatprep.mubr.f32.mxu1 %v4782_v0 }
 0x151   :  { %4354 = vmatprep.subr.bf16.mxu1 %v5217_v21 }
 0x154   :  { %4356 = vmatpush1.bf16.msra.mxu1 %v5224_v27 }
 0x155   :  { %4358 = vmatprep.subr.bf16.mxu1 %v5228_v28 }
 0x158   :  { %4360 = vmatpush1.bf16.msra.mxu1 %v5231_v33 }
 0x159   :  { %4362 = vmatprep.subr.bf16.mxu1 %v5234_v34 }
 0x15c   :  { %4364 = vmatpush1.bf16.msra.mxu1 %v5237_v37 }
 0x15d   :  { %v1463_v41 = vpop.f32.mrb[4].mxu0  ;;  %v1870_v42 = vpop.f32.mrb[4].mxu1  ;;  %3759 = vmatprep.subr.msk.mxu1 %vm1957_vm2, %v5240_v38 }
 0x15e   :  { %v1465_v45 = vpop.f32.mrb[5].mxu0  ;;  %v1872_v46 = vpop.f32.mrb[5].mxu1 }
 0x15f   :  { %v1478_v47 = vmax.f32 %v1463_v41, %v1465_v45  ;;  %v1885_v48 = vmax.f32 %v1870_v42, %v1872_v46  ;;  %v2255_v41 = vld [vmem:[#allocation8 + $0x230] sm:$0xff]  ;;  %v2260_v45 = vld [vmem:[#allocation8 + $0x258] sm:$0xff]  ;;  %v2262_v46 = vld [vmem:[#allocation8 + $0x268] sm:$0xff] }
 0x160   :  { %3760 = vmatpush1.msk.msra.mxu1 %vm1957_vm2, %v5245_v43 }
 0x161   :  { %v1887_v49 = vmax.f32 %v1478_v47, %v1885_v48  ;;  %v1469_v50 = vpop.f32.mrb[6].mxu0  ;;  %v1876_v51 = vpop.f32.mrb[6].mxu1  ;;  %4366 = vmatprep.subr.bf16.mxu1 %v5247_v44  ;;  %v5331_v48 = vpack.c.bf16 %v2262_v46, %v2260_v45  ;;  %v2923_v45 = vld [vmem:[#allocation10 + $0x50] sm:$0xff]  ;;  %v2924_v46 = vld [vmem:[#allocation10 + $0x58] sm:$0xff] }
 0x162   :  { %v1471_v52 = vpop.f32.mrb[7].mxu0  ;;  %v1878_v53 = vpop.f32.mrb[7].mxu1 }
 0x163   :  { %v1896_v54 = vadd.f32 %v5198_v59, %v1887_v49  ;;  %v1479_v55 = vmax.f32 %v1469_v50, %v1471_v52  ;;  %v1886_v56 = vmax.f32 %v1876_v51, %v1878_v53  ;;  %v2259_v49 = vld [vmem:[#allocation8 + $0x250] sm:$0xff]  ;;  %v2261_v50 = vld [vmem:[#allocation8 + $0x260] sm:$0xff]  ;;  %v2264_v52 = vld [vmem:[#allocation8 + $0x278] sm:$0xff] }
 0x164   :  { %v2266_v53 = vld [vmem:[#allocation8 + $0x288] sm:$0xff] }
 0x165   :  { %v1898_v57 = vmax.f32 %v1896_v54, 0.0  ;;  %v1888_v58 = vmax.f32 %v1479_v55, %v1886_v56  ;;  %v5342_v54 = vpack.c.bf16 %v2261_v50, %v2259_v49  ;;  %v5346_v55 = vpack.c.bf16 %v2266_v53, %v2264_v52  ;;  %v2263_v56 = vld [vmem:[#allocation8 + $0x270] sm:$0xff]  ;;  %v2926_v50 = vld [vmem:[#allocation10 + $0x68] sm:$0xff] }
 0x166   :  { %v2925_v49 = vld [vmem:[#allocation10 + $0x60] sm:$0xff]  ;;  %v2916_v53 = vld [vmem:[#allocation10 + $0x28] sm:$0xff] }
 0x167   :  { %1900 = vst.msk [vmem:[#allocation3] sm:$0xff] %vm83_vm1, %v1898_v57  ;;  %v1897_v60 = vadd.f32 %v5198_v59, %v1888_v58  ;;  %v5264_v59 = vpack.c.bf16 %v2139_v6, %v2137_v5  ;;  %v2265_v57 = vld [vmem:[#allocation8 + $0x280] sm:$0xff]  ;;  %v2268_v58 = vld [vmem:[#allocation8 + $0x298] sm:$0xff]  ;;  %v2370_v5 = vld [vmem:[#allocation8 + $0x2c8] sm:$0xff] }
 0x168   :  { %v2372_v6 = vld [vmem:[#allocation8 + $0x2d8] sm:$0xff]  ;;  %v2915_v52 = vld [vmem:[#allocation10 + $0x20] sm:$0xff] }
 0x169   :  { %v1899_v61 = vmax.f32 %v1897_v60, 0.0  ;;  %v2270_v60 = vld [vmem:[#allocation8 + $0x2a8] sm:$0xff]  ;;  %v5374_v12 = vpack.c.bf16 %v2372_v6, %v2370_v5  ;;  %v2931_v6 = vld [vmem:[#allocation10 + $0x90] sm:$0xff] }
 0x16a   :  { %v5356_v62 = vpack.c.bf16 %v2270_v60, %v2268_v58  ;;  %v2917_v58 = vld [vmem:[#allocation10 + $0x30] sm:$0xff]  ;;  %v2918_v60 = vld [vmem:[#allocation10 + $0x38] sm:$0xff] }
 0x16b   :  { %1901 = vst.msk [vmem:[#allocation3 + $0x8] sm:$0x7f] %vm999_vm3, %v1899_v61  ;;  %v5352_v61 = vpack.c.bf16 %v2265_v57, %v2263_v56  ;;  %v2928_v56 = vld [vmem:[#allocation10 + $0x78] sm:$0xff] }
 0x16e   :  { %v1926_v7 = vld [vmem:[#allocation3] sm:$0xff] }
 0x16f   :  { %3737 = vmatmul.mubr.msk.f32.vlgmr.msra.gmra.mrb[8].mxu0 %vm83_vm1, %v1926_v7  ;;  %3761 = vmatmul.mubr.msk.f32.vlgmr.msra.gmra.mrb[8].mxu1 %vm83_vm1, %v1926_v7  ;;  %v2369_v7 = vld [vmem:[#allocation8 + $0x2c0] sm:$0xff] }
 0x170   :  { %4248 = vmatpush1.bf16.msra.mxu0 %v5204_v13  ;;  %4368 = vmatpush1.bf16.msra.mxu1 %v5256_v3  ;;  %v5276_v13 = vpack.c.bf16 %v2143_v9, %v2141_v8  ;;  %v2376_v8 = vld [vmem:[#allocation8 + $0x2f8] sm:$0xff]  ;;  %v2373_v9 = vld [vmem:[#allocation8 + $0x2e0] sm:$0xff] }
 0x171   :  { %2034 = vmatprep.mubr.f32.mxu0 %v4782_v0  ;;  %4250 = vmatprep.subr.bf16.mxu0 %v5206_v14  ;;  %v5280_v14 = vpack.c.bf16 %v2148_v18, %v2146_v16  ;;  %v5385_v16 = vld [vmem:[#allocation2 + $0x2] sm:$0xff]  ;;  %v2378_v18 = vld [vmem:[#allocation8 + $0x308] sm:$0xff] }
 0x172   :  { %2633 = vmatprep.mubr.f32.mxu1 %v4782_v0  ;;  %4370 = vmatprep.subr.bf16.mxu1 %v5258_v10  ;;  %v1927_v15 = vld [vmem:[#allocation3 + $0x8] sm:$0x3f] }
 0x173   :  { %3738 = vmatmul.mubr.msk.f32.gmra.mrb[10].mxu0 %vm83_vm1, %v1927_v15  ;;  %3762 = vmatmul.mubr.msk.f32.gmra.mrb[10].mxu1 %vm83_vm1, %v1927_v15  ;;  %v5318_v42 = vld [vmem:[#allocation3 + $0x1] sm:$0xff]  ;;  %v5335_v51 = vld [vmem:[#allocation3 + $0x9] sm:$0x3f]  ;;  %v2375_v15 = vld [vmem:[#allocation8 + $0x2f0] sm:$0xff] }
 0x174   :  { %4252 = vmatpush1.bf16.msra.mxu0 %v5214_v20  ;;  %4372 = vmatpush1.bf16.msra.mxu1 %v5264_v59  ;;  %v5286_v20 = vpack.c.bf16 %v2147_v22, %v2145_v19  ;;  %v4311_v19 = vpack.c.bf16 %v2375_v15, %v2373_v9  ;;  %v2377_v22 = vld [vmem:[#allocation8 + $0x300] sm:$0xff] }
 0x175   :  { %4254 = vmatprep.subr.bf16.mxu0 %v5217_v21  ;;  %4374 = vmatprep.subr.bf16.mxu1 %v5268_v4  ;;  %v5290_v21 = vpack.c.bf16 %v2152_v25, %v2150_v23  ;;  %v2379_v23 = vld [vmem:[#allocation8 + $0x310] sm:$0xff]  ;;  %v2367_v25 = vld [vmem:[#allocation2 + $0xa] sm:$0x3f] }
 0x176   :  { %2117 = vmatprep.mubr.f32.mxu0 %v4782_v0  ;;  %2704 = vmatprep.mubr.f32.mxu1 %v4782_v0  ;;  %v4315_v26 = vpack.c.bf16 %v2379_v23, %v2377_v22 }
 0x178   :  { %4256 = vmatpush1.bf16.msra.mxu0 %v5224_v27  ;;  %4376 = vmatpush1.bf16.msra.mxu1 %v5276_v13  ;;  %v5298_v27 = vld [vmem:[#allocation8 + $0x208] sm:$0xf] }
 0x179   :  { %4258 = vmatprep.subr.bf16.mxu0 %v5228_v28  ;;  %4378 = vmatprep.subr.bf16.mxu1 %v5280_v14  ;;  %v2254_v28 = vld [vmem:[#allocation8 + $0x228] sm:$0xff] }
 0x17c   :  { %4260 = vmatpush1.bf16.msra.mxu0 %v5231_v33  ;;  %4380 = vmatpush1.bf16.msra.mxu1 %v5286_v20  ;;  %v5306_v33 = vld [vmem:[#allocation8 + $0x200] sm:$0xf] }
 0x17d   :  { %4262 = vmatprep.subr.bf16.mxu0 %v5234_v34  ;;  %4382 = vmatprep.subr.bf16.mxu1 %v5290_v21  ;;  %v5308_v34 = vpack.c.bf16 %v2254_v28, %v2252_v31  ;;  %v2386_v31 = vld [vmem:[#allocation8 + $0x348] sm:$0xff] }
 0x180   :  { %4264 = vmatpush1.bf16.msra.mxu0 %v5237_v37  ;;  %4384 = vmatpush1.bf16.msra.mxu1 %v5294_v30  ;;  %v1902_v37 = vld [vmem:[#allocation2] sm:$0xff] }
 0x181   :  { %3739 = vmatprep.subr.msk.mxu0 %vm1957_vm2, %v5240_v38  ;;  %3763 = vmatprep.subr.msk.mxu1 %vm1957_vm2, %v5298_v27  ;;  %v2257_v38 = vld [vmem:[#allocation8 + $0x240] sm:$0xff] }
 0x182   :  { %v5327_v47 = vpack.c.bf16 %v2257_v38, %v2255_v41  ;;  %v2911_v41 = vld [vmem:[#allocation10] sm:$0xff]  ;;  %v2912_v38 = vld [vmem:[#allocation10 + $0x8] sm:$0xff] }
 0x184   :  { %3740 = vmatpush1.msk.msra.mxu0 %vm1957_vm2, %v5245_v43  ;;  %3764 = vmatpush1.msk.msra.mxu1 %vm1957_vm2, %v5306_v33  ;;  %v5323_v43 = vpack.c.bf16 %v2258_v40, %v2256_v39  ;;  %v2389_v39 = vld [vmem:[#allocation8 + $0x360] sm:$0xf] }
 0x185   :  { %3741 = vmatmul.mubr.msk.f32.vlgmr.msra.gmra.mrb[8].mxu0 %vm83_vm1, %v1902_v37  ;;  %4266 = vmatprep.subr.bf16.mxu0 %v5247_v44  ;;  %v1903_v44 = vld [vmem:[#allocation2 + $0x8] sm:$0x3f]  ;;  %v2802_v40 = vld [vmem:[#allocation3 + $0x2] sm:$0xff]  ;;  %v2803_v37 = vld [vmem:[#allocation3 + $0xa] sm:$0x3f] }
 0x186   :  { %3765 = vmatmul.mubr.msk.f32.vlgmr.msra.gmra.mrb[8].mxu1 %vm83_vm1, %v5318_v42  ;;  %4386 = vmatprep.subr.bf16.mxu1 %v5308_v34 }
 0x187   :  { %4268 = vmatpush1.bf16.msra.mxu0 %v5256_v3  ;;  %4388 = vmatpush1.bf16.msra.mxu1 %v5310_v36  ;;  %v5364_v3 = vld [vmem:[#allocation8 + $0x2b8] sm:$0xf] }
 0x188   :  { %2123 = vmatprep.mubr.f32.mxu0 %v4782_v0  ;;  %2710 = vmatprep.mubr.f32.mxu1 %v4782_v0 }
 0x189   :  { %3742 = vmatmul.mubr.msk.f32.gmra.mrb[10].mxu0 %vm83_vm1, %v1903_v44  ;;  %4270 = vmatprep.subr.bf16.mxu0 %v5258_v10  ;;  %v2371_v10 = vld [vmem:[#allocation8 + $0x2d0] sm:$0xff]  ;;  %v2914_v44 = vld [vmem:[#allocation10 + $0x18] sm:$0xff] }
 0x18a   :  { %3766 = vmatmul.mubr.msk.f32.gmra.mrb[10].mxu1 %vm83_vm1, %v5335_v51  ;;  %4390 = vmatprep.subr.bf16.mxu1 %v5323_v43 }
 0x18b   :  { %4272 = vmatpush1.bf16.msra.mxu0 %v5264_v59  ;;  %4392 = vmatpush1.bf16.msra.mxu1 %v5327_v47  ;;  %v5376_v59 = vpack.c.bf16 %v2371_v10, %v2369_v7  ;;  %v2932_v7 = vld [vmem:[#allocation10 + $0x98] sm:$0xff] }
 0x18c   :  { %4274 = vmatprep.subr.bf16.mxu0 %v5268_v4  ;;  %4394 = vmatprep.subr.bf16.mxu1 %v5331_v48  ;;  %v2374_v4 = vld [vmem:[#allocation8 + $0x2e8] sm:$0xff]  ;;  %v4441_v10 = vpack.c.bf16 %v2932_v7, %v2931_v6 }
 0x18d   :  { %2231 = vmatprep.mubr.f32.mxu0 %v4782_v0  ;;  %2785 = vmatprep.mubr.f32.mxu1 %v4782_v0  ;;  %v3290_v6 = vld [vmem:[#allocation10 + $0x158] sm:$0xff] }
 0x18f   :  { %4276 = vmatpush1.bf16.msra.mxu0 %v5276_v13  ;;  %4396 = vmatpush1.bf16.msra.mxu1 %v5342_v54  ;;  %v2380_v13 = vld [vmem:[#allocation8 + $0x318] sm:$0xff] }
 0x190   :  { %4278 = vmatprep.subr.bf16.mxu0 %v5280_v14  ;;  %4398 = vmatprep.subr.bf16.mxu1 %v5346_v55  ;;  %v4309_v14 = vpack.c.bf16 %v2376_v8, %v2374_v4 }
 0x193   :  { %4280 = vmatpush1.bf16.msra.mxu0 %v5286_v20  ;;  %4400 = vmatpush1.bf16.msra.mxu1 %v5352_v61  ;;  %v2382_v20 = vld [vmem:[#allocation8 + $0x328] sm:$0xff] }
 0x194   :  { %4282 = vmatprep.subr.bf16.mxu0 %v5290_v21  ;;  %4402 = vmatprep.subr.bf16.mxu1 %v5356_v62  ;;  %v2384_v21 = vld [vmem:[#allocation8 + $0x338] sm:$0xff] }
 0x195   :  { %v4317_v29 = vpack.c.bf16 %v2384_v21, %v2382_v20 }
 0x197   :  { %4284 = vmatpush1.bf16.msra.mxu0 %v5294_v30  ;;  %4404 = vmatpush1.bf16.msra.mxu1 %v5360_v2  ;;  %v2381_v30 = vld [vmem:[#allocation8 + $0x320] sm:$0xff] }
 0x198   :  { %3743 = vmatprep.subr.msk.mxu0 %vm1957_vm2, %v5298_v27  ;;  %3767 = vmatprep.subr.msk.mxu1 %vm1957_vm2, %v5364_v3  ;;  %v2383_v27 = vld [vmem:[#allocation8 + $0x330] sm:$0xff] }
 0x199   :  { %v4319_v28 = vpack.c.bf16 %v2383_v27, %v2381_v30 }
 0x19b   :  { %3744 = vmatpush1.msk.msra.mxu0 %vm1957_vm2, %v5306_v33  ;;  %3768 = vmatpush1.msk.msra.mxu1 %vm1957_vm2, %v5372_v11  ;;  %v2387_v33 = vld [vmem:[#allocation8 + $0x350] sm:$0xff] }
 0x19c   :  { %3745 = vmatmul.mubr.msk.f32.vlgmr.msra.gmra.mrb[8].mxu0 %vm83_vm1, %v5208_v17  ;;  %4286 = vmatprep.subr.bf16.mxu0 %v5308_v34  ;;  %v4313_v17 = vpack.c.bf16 %v2380_v13, %v2378_v18  ;;  %v4323_v34 = vpack.c.bf16 %v2387_v33, %v2385_v35  ;;  %v3101_v35 = vld [vmem:[#allocation10 + $0xc0] sm:$0xff]  ;;  %v3102_v33 = vld [vmem:[#allocation10 + $0xc8] sm:$0xff] }
 0x19d   :  { %3769 = vmatmul.mubr.msk.f32.vlgmr.msra.gmra.mrb[8].mxu1 %vm83_vm1, %v5385_v16  ;;  %4406 = vmatprep.subr.bf16.mxu1 %v5374_v12 }
 0x19e   :  { %4288 = vmatpush1.bf16.msra.mxu0 %v5310_v36  ;;  %4408 = vmatpush1.bf16.msra.mxu1 %v5376_v59  ;;  %v2390_v36 = vld [vmem:[#allocation8 + $0x368] sm:$0xf] }
 0x19f   :  { %2237 = vmatprep.mubr.f32.mxu0 %v4782_v0  ;;  %2791 = vmatprep.mubr.f32.mxu1 %v4782_v0 }
 0x1a0   :  { %3746 = vmatmul.mubr.msk.f32.gmra.mrb[10].mxu0 %vm83_vm1, %v5219_v24  ;;  %4290 = vmatprep.subr.bf16.mxu0 %v5323_v43  ;;  %v2388_v24 = vld [vmem:[#allocation8 + $0x358] sm:$0xff]  ;;  %v4425_v43 = vpack.c.bf16 %v2924_v46, %v2923_v45  ;;  %v3105_v45 = vld [vmem:[#allocation10 + $0xe0] sm:$0xff] }
 0x1a1   :  { %3770 = vmatmul.mubr.msk.f32.gmra.mrb[10].mxu1 %vm83_vm1, %v2367_v25  ;;  %4410 = vmatprep.subr.bf16.mxu1 %v4309_v14  ;;  %v4321_v32 = vpack.c.bf16 %v2388_v24, %v2386_v31  ;;  %v3099_v24 = vld [vmem:[#allocation10 + $0xb0] sm:$0xff]  ;;  %v3106_v46 = vld [vmem:[#allocation10 + $0xe8] sm:$0xff] }
 0x1a2   :  { %4292 = vmatpush1.bf16.msra.mxu0 %v5327_v47  ;;  %4412 = vmatpush1.bf16.msra.mxu1 %v4311_v19  ;;  %v2913_v47 = vld [vmem:[#allocation10 + $0x10] sm:$0xff] }
 0x1a3   :  { %4294 = vmatprep.subr.bf16.mxu0 %v5331_v48  ;;  %4414 = vmatprep.subr.bf16.mxu1 %v4313_v17  ;;  %v4449_v48 = vpack.c.bf16 %v2914_v44, %v2913_v47  ;;  %v3192_v47 = vld [vmem:[#allocation10 + $0xf0] sm:$0xff]  ;;  %v3193_v44 = vld [vmem:[#allocation10 + $0xf8] sm:$0xff] }
 0x1a4   :  { %2349 = vmatprep.mubr.f32.mxu0 %v4782_v0  ;;  %2874 = vmatprep.mubr.f32.mxu1 %v4782_v0 }
 0x1a6   :  { %4296 = vmatpush1.bf16.msra.mxu0 %v5342_v54  ;;  %4416 = vmatpush1.bf16.msra.mxu1 %v4315_v26  ;;  %v4453_v54 = vpack.c.bf16 %v2916_v53, %v2915_v52  ;;  %v3196_v53 = vld [vmem:[#allocation10 + $0x110] sm:$0xff] }
 0x1a7   :  { %4298 = vmatprep.subr.bf16.mxu0 %v5346_v55  ;;  %4418 = vmatprep.subr.bf16.mxu1 %v4317_v29  ;;  %v2927_v55 = vld [vmem:[#allocation10 + $0x70] sm:$0xff] }
 0x1a8   :  { %v4433_v57 = vpack.c.bf16 %v2928_v56, %v2927_v55 }
 0x1aa   :  { %4300 = vmatpush1.bf16.msra.mxu0 %v5352_v61  ;;  %4420 = vmatpush1.bf16.msra.mxu1 %v4319_v28  ;;  %v4457_v61 = vpack.c.bf16 %v2918_v60, %v2917_v58  ;;  %v3199_v58 = vld [vmem:[#allocation10 + $0x128] sm:$0xff] }
 0x1ab   :  { %4302 = vmatprep.subr.bf16.mxu0 %v5356_v62  ;;  %4422 = vmatprep.subr.bf16.mxu1 %v4321_v32  ;;  %v2929_v62 = vld [vmem:[#allocation10 + $0x80] sm:$0xff] }
 0x1ac   :  { %v4437_v1 = vpack.c.bf16 %v2930_v63, %v2929_v62  ;;  %v3201_v62 = vld [vmem:[#allocation10 + $0x138] sm:$0xff] }
 0x1ae   :  { %4304 = vmatpush1.bf16.msra.mxu0 %v5360_v2  ;;  %4424 = vmatpush1.bf16.msra.mxu1 %v4323_v34  ;;  %v2919_v2 = vld [vmem:[#allocation10 + $0x40] sm:$0xff] }
 0x1af   :  { %3747 = vmatprep.subr.msk.mxu0 %vm1957_vm2, %v5364_v3  ;;  %3771 = vmatprep.subr.msk.mxu1 %vm1957_vm2, %v2390_v36  ;;  %v2920_v3 = vld [vmem:[#allocation10 + $0x48] sm:$0xff] }
 0x1b0   :  { %v4461_v5 = vpack.c.bf16 %v2920_v3, %v2919_v2  ;;  %v3288_v2 = vld [vmem:[#allocation10 + $0x148] sm:$0xff] }
 0x1b2   :  { %3748 = vmatpush1.msk.msra.mxu0 %vm1957_vm2, %v5372_v11  ;;  %3772 = vmatpush1.msk.msra.mxu1 %vm1957_vm2, %v2389_v39  ;;  %v3097_v11 = vld [vmem:[#allocation10 + $0xa0] sm:$0xff] }
 0x1b3   :  { %3749 = vmatmul.mubr.msk.f32.vlgmr.msra.gmra.mrb[8].mxu0 %vm83_vm1, %v5318_v42  ;;  %4306 = vmatprep.subr.bf16.mxu0 %v5374_v12  ;;  %v4445_v42 = vpack.c.bf16 %v2912_v38, %v2911_v41  ;;  %v3098_v12 = vld [vmem:[#allocation10 + $0xa8] sm:$0xff]  ;;  %v3103_v41 = vld [vmem:[#allocation10 + $0xd0] sm:$0xff]  ;;  %v3104_v38 = vld [vmem:[#allocation10 + $0xd8] sm:$0xff] }
 0x1b4   :  { %3773 = vmatmul.mubr.msk.f32.vlgmr.msra.gmra.mrb[8].mxu1 %vm83_vm1, %v2802_v40  ;;  %4308 = vmatpush1.bf16.msra.mxu0 %v5376_v59  ;;  %v4465_v59 = vpack.c.bf16 %v3098_v12, %v3097_v11  ;;  %v3291_v11 = vld [vmem:[#allocation10 + $0x160] sm:$0xff]  ;;  %v3292_v12 = vld [vmem:[#allocation10 + $0x168] sm:$0xff] }
 0x1b5   :  { %2355 = vmatprep.mubr.f32.mxu0 %v4782_v0  ;;  %2880 = vmatprep.mubr.f32.mxu1 %v4782_v0 }
 0x1b6   :  { %4310 = vmatprep.subr.bf16.mxu0 %v4309_v14  ;;  %4426 = vmatprep.subr.bf16.mxu1 %v4425_v43 }
 0x1b7   :  { %3750 = vmatmul.mubr.msk.f32.gmra.mrb[10].mxu0 %vm83_vm1, %v5335_v51  ;;  %4428 = vmatpush3.bf16.msra.mxu1 %v4425_v43  ;;  %v4429_v51 = vpack.c.bf16 %v2926_v50, %v2925_v49  ;;  %v4481_v43 = vpack.c.bf16 %v3106_v46, %v3105_v45  ;;  %v3194_v49 = vld [vmem:[#allocation10 + $0x100] sm:$0xff]  ;;  %v3195_v50 = vld [vmem:[#allocation10 + $0x108] sm:$0xff]  ;;  %v3477_v45 = vld [vmem:[%s5581_s7 + $0x58] sm:$0xff] }
 0x1b8   :  { %3774 = vmatmul.mubr.msk.f32.gmra.mrb[10].mxu1 %vm83_vm1, %v2803_v37  ;;  %4312 = vmatpush1.bf16.msra.mxu0 %v4311_v19  ;;  %v4473_v37 = vpack.c.bf16 %v3102_v33, %v3101_v35  ;;  %v3470_v35 = vld [vmem:[%s5581_s7 + $0x20] sm:$0xff]  ;;  %v3471_v33 = vld [vmem:[%s5581_s7 + $0x28] sm:$0xff] }
 0x1b9   :  { %4314 = vmatprep.subr.bf16.mxu0 %v4313_v17  ;;  %2467 = vmatprep.mubr.f32.mxu0 %v4782_v0  ;;  %v3775_v17 = vld [vmem:[%s5578_s4] ss:$0 sm:$0xff] }
 0x1ba   :  { %4430 = vmatprep.subr.bf16.mxu1 %v4429_v51 }
 0x1bb   :  { %4432 = vmatpush3.bf16.msra.mxu1 %v4429_v51  ;;  %v4489_v51 = vpack.c.bf16 %v3195_v50, %v3194_v49  ;;  %v3786_v49 = vld [vmem:[%s5580_s6] ss:$0 sm:$0xff] }
 0x1bc   :  { %4316 = vmatpush1.bf16.msra.mxu0 %v4315_v26  ;;  %4434 = vmatprep.subr.bf16.mxu1 %v4433_v57  ;;  %v3563_v50 = vld [vmem:[%s5583_s9] sm:$0xff] }
 0x1bd   :  { %4318 = vmatprep.subr.bf16.mxu0 %v4317_v29 }
 0x1bf   :  { %4436 = vmatpush3.bf16.msra.mxu1 %v4433_v57  ;;  %v3198_v57 = vld [vmem:[#allocation10 + $0x120] sm:$0xff] }
 0x1c0   :  { %4320 = vmatpush1.bf16.msra.mxu0 %v4319_v28  ;;  %4438 = vmatprep.subr.bf16.mxu1 %v4437_v1  ;;  %v3100_v28 = vld [vmem:[#allocation10 + $0xb8] sm:$0xff]  ;;  %v4497_v60 = vpack.c.bf16 %v3199_v58, %v3198_v57  ;;  %v3565_v57 = vld [vmem:[%s5583_s9 + $0x10] sm:$0xff] }
 0x1c1   :  { %4322 = vmatprep.subr.bf16.mxu0 %v4321_v32  ;;  %v4469_v32 = vpack.c.bf16 %v3100_v28, %v3099_v24  ;;  %v3468_v24 = vld [vmem:[%s5581_s7 + $0x10] sm:$0xff]  ;;  %v3469_v28 = vld [vmem:[%s5581_s7 + $0x18] sm:$0xff] }
 0x1c2   :  { %v3566_v58 = vld [vmem:[%s5583_s9 + $0x18] sm:$0xff] }
 0x1c3   :  { %4440 = vmatpush3.bf16.msra.mxu1 %v4437_v1  ;;  %v3287_v1 = vld [vmem:[#allocation10 + $0x140] sm:$0xff] }
 0x1c4   :  { %4324 = vmatpush1.bf16.msra.mxu0 %v4323_v34  ;;  %4442 = vmatprep.subr.bf16.mxu1 %v4441_v10  ;;  %v4505_v3 = vpack.c.bf16 %v3288_v2, %v3287_v1  ;;  %v3569_v1 = vld [vmem:[%s5583_s9 + $0x30] sm:$0xff]  ;;  %v3570_v2 = vld [vmem:[%s5583_s9 + $0x38] sm:$0xff] }
 0x1c5   :  { %3751 = vmatprep.subr.msk.mxu0 %vm1957_vm2, %v2390_v36 }
 0x1c7   :  { %4444 = vmatpush3.bf16.msra.mxu1 %v4441_v10 }
 0x1c8   :  { %3752 = vmatpush1.msk.msra.mxu0 %vm1957_vm2, %v2389_v39 }
 0x1c9   :  { %3753 = vmatmul.mubr.msk.f32.vlgmr.msra.gmra.mrb[8].mxu0 %vm83_vm1, %v5385_v16  ;;  %4446 = vmatprep.subr.bf16.mxu0 %v4445_v42 }
 0x1ca   :  { %2473 = vmatprep.mubr.f32.mxu0 %v4782_v0  ;;  %4448 = vmatpush3.bf16.msra.mxu0 %v4445_v42  ;;  %v4477_v42 = vpack.c.bf16 %v3104_v38, %v3103_v41  ;;  %v3475_v41 = vld [vmem:[%s5581_s7 + $0x48] sm:$0xff] }
 0x1cb   :  { %4450 = vmatprep.subr.bf16.mxu0 %v4449_v48 }
 0x1cd   :  { %3754 = vmatmul.mubr.msk.f32.gmra.mrb[10].mxu0 %vm83_vm1, %v2367_v25 }
 0x1ce   :  { %4452 = vmatpush3.bf16.msra.mxu0 %v4449_v48  ;;  %v4485_v48 = vpack.c.bf16 %v3193_v44, %v3192_v47  ;;  %v3479_v47 = vld [vmem:[%s5581_s7 + $0x68] sm:$0xff] }
 0x1cf   :  { %4454 = vmatprep.subr.bf16.mxu0 %v4453_v54 }
 0x1d2   :  { %4456 = vmatpush3.bf16.msra.mxu0 %v4453_v54  ;;  %v3197_v54 = vld [vmem:[#allocation10 + $0x118] sm:$0xff] }
 0x1d3   :  { %4458 = vmatprep.subr.bf16.mxu0 %v4457_v61  ;;  %v4493_v56 = vpack.c.bf16 %v3197_v54, %v3196_v53 }
 0x1d6   :  { %4460 = vmatpush3.bf16.msra.mxu0 %v4457_v61  ;;  %v3200_v61 = vld [vmem:[#allocation10 + $0x130] sm:$0xff] }
 0x1d7   :  { %4462 = vmatprep.subr.bf16.mxu0 %v4461_v5  ;;  %v4501_v63 = vpack.c.bf16 %v3201_v62, %v3200_v61  ;;  %v3567_v61 = vld [vmem:[%s5583_s9 + $0x20] sm:$0xff]  ;;  %v3568_v62 = vld [vmem:[%s5583_s9 + $0x28] sm:$0xff] }
 0x1da   :  { %4464 = vmatpush3.bf16.msra.mxu0 %v4461_v5  ;;  %v3289_v5 = vld [vmem:[#allocation10 + $0x150] sm:$0xff] }
 0x1db   :  { %4466 = vmatprep.subr.bf16.mxu0 %v4465_v59  ;;  %v4509_v7 = vpack.c.bf16 %v3290_v6, %v3289_v5  ;;  %v3571_v5 = vld [vmem:[%s5583_s9 + $0x40] sm:$0xff]  ;;  %v3572_v6 = vld [vmem:[%s5583_s9 + $0x48] sm:$0xff] }
 0x287   :  { %v2876_v4 = vpop.f32.mrb[8].mxu1 }
 0x288   :  { %v2878_v8 = vpop.f32.mrb[9].mxu1 }
 0x289   :  { %v2891_v9 = vmax.f32 %v2876_v4, %v2878_v8  ;;  %v4513_v4 = vpack.c.bf16 %v3292_v12, %v3291_v11  ;;  %v3293_v8 = vld [vmem:[#allocation10 + $0x170] sm:$0xff]  ;;  %v3789_v11 = vld [vmem:[%s5582_s8] ss:$0 sm:$0xff] }
 0x28b   :  { %v2882_v15 = vpop.f32.mrb[10].mxu1 }
 0x28c   :  { %v2884_v16 = vpop.f32.mrb[11].mxu1 }
 0x28d   :  { %v2892_v18 = vmax.f32 %v2882_v15, %v2884_v16  ;;  %v3295_v16 = vld [vmem:[#allocation10 + $0x180] sm:$0xff] }
 0x29c   :  { %v2469_v13 = vpop.f32.mrb[8].mxu0 }
 0x29d   :  { %v2471_v14 = vpop.f32.mrb[9].mxu0 }
 0x29e   :  { %v2484_v19 = vmax.f32 %v2469_v13, %v2471_v14 }
 0x2a0   :  { %v2893_v22 = vmax.f32 %v2484_v19, %v2891_v9  ;;  %v2475_v23 = vpop.f32.mrb[10].mxu0  ;;  %v3294_v9 = vld [vmem:[#allocation10 + $0x178] sm:$0xff]  ;;  %v4783_v19 = vmov 0.0|0.0  }
 0x2a1   :  { %v2477_v25 = vpop.f32.mrb[11].mxu0  ;;  %v4517_v15 = vpack.c.bf16 %v3294_v9, %v3293_v8  ;;  %4525 = vmatprep.subr.bf16.mxu1 %v4783_v19 }
 0x2a2   :  { %v2902_v20 = vadd.f32 %v3775_v17, %v2893_v22  ;;  %v2485_v21 = vmax.f32 %v2475_v23, %v2477_v25 }
 0x2a4   :  { %v2904_v26 = vmax.f32 %v2902_v20, 0.0  ;;  %v2894_v29 = vmax.f32 %v2485_v21, %v2892_v18  ;;  %v3296_v18 = vld [vmem:[#allocation10 + $0x188] sm:$0xff] }
 0x2a5   :  { %v4521_v13 = vpack.c.bf16 %v3296_v18, %v3295_v16 }
 0x2a6   :  { %2906 = vst.msk [vmem:[#allocation4] sm:$0xff] %vm88_vm4, %v2904_v26  ;;  %v2903_v30 = vadd.f32 %v3775_v17, %v2894_v29  ;;  %v3466_v26 = vld [vmem:[%s5581_s7] sm:$0xff]  ;;  %v3467_v29 = vld [vmem:[%s5581_s7 + $0x8] sm:$0xff] }
 0x2a8   :  { %v2905_v27 = vmax.f32 %v2903_v30, 0.0 }
 0x2aa   :  { %2908 = vst.msk [vmem:[#allocation4 + $0x8] sm:$0x3f] %vm2907_vm5, %v2905_v27  ;;  %v3380_v27 = vld [vmem:[%s5585_s11] sm:$0x3] }
 0x2ad   :  { %v2909_v31 = vld [vmem:[#allocation4] sm:$0xff] }
 0x2ae   :  { %3928 = vmatprep.mubr.msk.f32.mxu0 %vm88_vm4, %v2909_v31  ;;  %v4530_v31 = vpack.c.bf16 %v3467_v29, %v3466_v26 }
 0x2b1   :  { %v2921_v34 = vld [vmem:[#allocation4 + $0x1] sm:$0xff]  ;;  %v2922_v39 = vld [vmem:[#allocation4 + $0x9] sm:$0xf] }
 0x2b2   :  { %v2910_v36 = vld [vmem:[#allocation4 + $0x8] sm:$0xf]  ;;  %3905 = vmatprep.mubr.msk.f32.mxu1 %vm88_vm4, %v2921_v34  ;;  %v3286_v14 = vld [vmem:[#allocation4 + $0xc] sm:$0xf]  ;;  %v4536_v34 = vpack.c.bf16 %v3471_v33, %v3470_v35 }
 0x2b3   :  { %3929 = vmatmul.mubr.msk.f32.vlgmr.msra.gmra.mrb[12].mxu0 %vm88_vm4, %v2910_v36  ;;  %v3095_v40 = vld [vmem:[#allocation4 + $0x2] sm:$0xff]  ;;  %3906 = vmatmul.mubr.msk.f32.vlgmr.msra.gmra.mrb[12].mxu1 %vm88_vm4, %v2922_v39  ;;  %v3096_v52 = vld [vmem:[#allocation4 + $0xa] sm:$0xf]  ;;  %v3472_v36 = vld [vmem:[%s5581_s7 + $0x30] sm:$0xff] }
 0x2b4   :  { %4468 = vmatpush3.bf16.msra.mxu0 %v4465_v59  ;;  %3951 = vmatprep.mubr.msk.f32.mxu0 %vm88_vm4, %v3095_v40  ;;  %v3190_v55 = vld [vmem:[#allocation4 + $0x3] sm:$0xff]  ;;  %v3191_v10 = vld [vmem:[#allocation4 + $0xb] sm:$0xf]  ;;  %v3473_v39 = vld [vmem:[%s5581_s7 + $0x38] sm:$0xff] }
 0x2b5   :  { %4470 = vmatprep.subr.bf16.mxu0 %v4469_v32  ;;  %v3285_v59 = vld [vmem:[#allocation4 + $0x4] sm:$0xff]  ;;  %4004 = vmatprep.mubr.msk.f32.mxu1 %vm4784_vm6, %v4782_v0  ;;  %v4539_v40 = vpack.c.bf16 %v3473_v39, %v3472_v36 }
 0x2b8   :  { %4472 = vmatpush3.bf16.msra.mxu0 %v4469_v32  ;;  %v4533_v32 = vpack.c.bf16 %v3469_v28, %v3468_v24 }
 0x2b9   :  { %4474 = vmatprep.subr.bf16.mxu0 %v4473_v37 }
 0x2bc   :  { %4476 = vmatpush3.bf16.msra.mxu0 %v4473_v37  ;;  %v3474_v37 = vld [vmem:[%s5581_s7 + $0x40] sm:$0xff] }
 0x2bd   :  { %4478 = vmatprep.subr.bf16.mxu0 %v4477_v42  ;;  %v4542_v38 = vpack.c.bf16 %v3475_v41, %v3474_v37 }
 0x2c0   :  { %4480 = vmatpush3.bf16.msra.mxu0 %v4477_v42  ;;  %v3476_v42 = vld [vmem:[%s5581_s7 + $0x50] sm:$0xff] }
 0x2c1   :  { %4482 = vmatprep.subr.bf16.mxu0 %v4481_v43  ;;  %v4545_v46 = vpack.c.bf16 %v3477_v45, %v3476_v42 }
 0x2c4   :  { %4484 = vmatpush3.bf16.msra.mxu0 %v4481_v43  ;;  %v3478_v43 = vld [vmem:[%s5581_s7 + $0x60] sm:$0xff] }
 0x2c5   :  { %4486 = vmatprep.subr.bf16.mxu0 %v4485_v48  ;;  %v4548_v44 = vpack.c.bf16 %v3479_v47, %v3478_v43 }
 0x2c7   :  { %3952 = vmatmul.mubr.msk.f32.vlgmr.msra.gmra.mrb[12].mxu0 %vm88_vm4, %v3096_v52 }
 0x2c8   :  { %4488 = vmatpush3.bf16.msra.mxu0 %v4485_v48  ;;  %3974 = vmatprep.mubr.msk.f32.mxu0 %vm88_vm4, %v3190_v55  ;;  %v3480_v48 = vld [vmem:[%s5581_s7 + $0x70] sm:$0xff] }
 0x2c9   :  { %4490 = vmatprep.subr.bf16.mxu0 %v4489_v51 }
 0x2cc   :  { %4492 = vmatpush3.bf16.msra.mxu0 %v4489_v51  ;;  %v3564_v51 = vld [vmem:[%s5583_s9 + $0x8] sm:$0xff] }
 0x2cd   :  { %4494 = vmatprep.subr.bf16.mxu0 %v4493_v56  ;;  %v4551_v55 = vpack.c.bf16 %v3564_v51, %v3563_v50 }
 0x2d0   :  { %4496 = vmatpush3.bf16.msra.mxu0 %v4493_v56 }
 0x2d1   :  { %4498 = vmatprep.subr.bf16.mxu0 %v4497_v60 }
 0x2d4   :  { %4500 = vmatpush3.bf16.msra.mxu0 %v4497_v60  ;;  %v4554_v60 = vpack.c.bf16 %v3566_v58, %v3565_v57 }
 0x2d5   :  { %4502 = vmatprep.subr.bf16.mxu0 %v4501_v63 }
 0x2d8   :  { %4504 = vmatpush3.bf16.msra.mxu0 %v4501_v63  ;;  %v4557_v63 = vpack.c.bf16 %v3568_v62, %v3567_v61 }
 0x2d9   :  { %4506 = vmatprep.subr.bf16.mxu0 %v4505_v3 }
 0x2db   :  { %3975 = vmatmul.mubr.msk.f32.vlgmr.msra.gmra.mrb[12].mxu0 %vm88_vm4, %v3191_v10  ;;  %v3573_v10 = vld [vmem:[%s5583_s9 + $0x50] sm:$0xf]  ;;  %s4747_s9 = scalar_lea.vmem %s3666_s30, 32 }
 0x2dc   :  { %4508 = vmatpush3.bf16.msra.mxu0 %v4505_v3  ;;  %3997 = vmatprep.mubr.msk.f32.mxu0 %vm88_vm4, %v3285_v59  ;;  %v4560_v3 = vpack.c.bf16 %v3570_v2, %v3569_v1  ;;  %p4748_p10 = scmp.ne.s32.totalorder %s3666_s30, %s4747_s9  ;;  %p4753_p12 = scmp.lt.s32.totalorder %s4747_s9, %s4747_s9 }
 0x2dd   :  { %4510 = vmatprep.subr.bf16.mxu0 %v4509_v7 }
 0x2de   :  { %p4754_p13 = por %p4753_p12, %p4752_p11 }
 0x2e0   :  { %4512 = vmatpush3.bf16.msra.mxu0 %v4509_v7  ;;  %v4563_v7 = vpack.c.bf16 %v3572_v6, %v3571_v5  ;;  %p4755_p0 = pnand %p4754_p13, %p4748_p10 }
 0x2e1   :  { %4514 = vmatprep.subr.bf16.mxu0 %v4513_v4 }
 0x2e4   :  { %4516 = vmatpush3.bf16.msra.mxu0 %v4513_v4 }
 0x2e5   :  { %4518 = vmatprep.subr.bf16.mxu0 %v4517_v15 }
 0x2e8   :  { %4520 = vmatpush3.bf16.msra.mxu0 %v4517_v15 }
 0x2e9   :  { %4522 = vmatprep.subr.bf16.mxu0 %v4521_v13 }
 0x2ec   :  { %4524 = vmatpush3.bf16.msra.mxu0 %v4521_v13 }
 0x2ef   :  { %3998 = vmatmul.mubr.msk.f32.vlgmr.msra.gmra.mrb[12].mxu0 %vm88_vm4, %v3286_v14 }
 0x386   :  { %v3907_v17 = vpop.f32.mrb[12].mxu1 }
 0x387   :  { %v3005_v22 = vpop.f32.mrb[13].mxu1 }
 0x3c2   :  { %v3999_v23 = vpop.f32.mrb[12].mxu0 }
 0x3c3   :  { %v4565_v25 = vadd.f32 %v3999_v23, %v3907_v17  ;;  %v3369_v20 = vpop.f32.mrb[13].mxu0 }
 0x3c4   :  { %v4566_v21 = vadd.f32 %v3369_v20, %v3005_v22 }
 0x3c6   :  { %v4526_v30 = vpack.c.bf16 %v4565_v25, %v4566_v21 }
 0x3c8   :  { %4528 = vmatpush3.bf16.msk.msra.mxu1 %vm4527_vm8, %v4526_v30 }
 0x3c9   :  { %4529 = vmatprep.subr.bf16.mxu1 %v4783_v19 }
 0x3cb   :  { %4005 = vmatmul.mubr.msk.f32.vlgmr.msra.gmra.mrb[14].mxu1 %vm3388_vm9, %v3380_v27 }
 0x3cc   :  { %4531 = vmatpush3.bf16.msra.mxu1 %v4530_v31  ;;  %4037 = vmatprep.mubr.msk.f32.mxu1 %vm4784_vm6, %v4782_v0 }
 0x3cd   :  { %4532 = vmatprep.subr.bf16.mxu1 %v4783_v19 }
 0x3d0   :  { %4534 = vmatpush3.bf16.msra.mxu1 %v4533_v32 }
 0x3d1   :  { %4535 = vmatprep.subr.bf16.mxu1 %v4783_v19 }
 0x3d4   :  { %4537 = vmatpush3.bf16.msra.mxu1 %v4536_v34 }
 0x3d5   :  { %4538 = vmatprep.subr.bf16.mxu1 %v4783_v19 }
 0x3d8   :  { %4540 = vmatpush3.bf16.msra.mxu1 %v4539_v40 }
 0x3d9   :  { %4541 = vmatprep.subr.bf16.mxu1 %v4783_v19 }
 0x3dc   :  { %4543 = vmatpush3.bf16.msra.mxu1 %v4542_v38 }
 0x3dd   :  { %4544 = vmatprep.subr.bf16.mxu1 %v4783_v19 }
 0x3e0   :  { %4546 = vmatpush3.bf16.msra.mxu1 %v4545_v46 }
 0x3e1   :  { %4547 = vmatprep.subr.bf16.mxu1 %v4783_v19 }
 0x3e4   :  { %4549 = vmatpush3.bf16.msra.mxu1 %v4548_v44 }
 0x3e5   :  { %4035 = vmatprep.subr.mxu1 %v4782_v0 }
 0x3e8   :  { %4036 = vmatpush3.msra.mxu1 %v3480_v48 }
 0x3e9   :  { %4550 = vmatprep.subr.bf16.mxu1 %v4783_v19 }
 0x49e   :  { %v3461_v52 = vpop.f32.mrb[14].mxu1 }
 0x49f   :  { %v3462_v53 = vadd.f32 %v3786_v49, %v3461_v52  ;;  %v4006_v54 = vpop.f32.mrb[15].mxu1 }
 0x4a1   :  { %v3465_v56 = vmax.f32 %v3462_v53, 0.0 }
 0x4a3   :  { %4038 = vmatmul.mubr.msk.f32.vlgmr.msra.gmra.mrb[16].mxu1 %vm3488_vm10, %v3465_v56 }
 0x4a4   :  { %4552 = vmatpush3.bf16.msra.mxu1 %v4551_v55  ;;  %4062 = vmatprep.mubr.msk.f32.mxu1 %vm4784_vm6, %v4782_v0 }
 0x4a5   :  { %4553 = vmatprep.subr.bf16.mxu1 %v4783_v19 }
 0x4a8   :  { %4555 = vmatpush3.bf16.msra.mxu1 %v4554_v60 }
 0x4a9   :  { %4556 = vmatprep.subr.bf16.mxu1 %v4783_v19 }
 0x4ac   :  { %4558 = vmatpush3.bf16.msra.mxu1 %v4557_v63 }
 0x4ad   :  { %4559 = vmatprep.subr.bf16.mxu1 %v4783_v19 }
 0x4b0   :  { %4561 = vmatpush3.bf16.msra.mxu1 %v4560_v3 }
 0x4b1   :  { %4562 = vmatprep.subr.bf16.mxu1 %v4783_v19 }
 0x4b4   :  { %4564 = vmatpush3.bf16.msra.mxu1 %v4563_v7 }
 0x4b5   :  { %4060 = vmatprep.subr.mxu1 %v4782_v0  ;;  %v3791_v0 = vld [vmem:[%s5584_s10] ss:$0 sm:$0xff] }
 0x4b8   :  { %4061 = vmatpush3.msk.msra.mxu1 %vm1957_vm2, %v3573_v10 }
 0x576   :  { %v3558_v12 = vpop.f32.mrb[16].mxu1 }
 0x577   :  { %v3559_v59 = vadd.f32 %v3789_v11, %v3558_v12  ;;  %v4039_v4 = vpop.f32.mrb[17].mxu1 }
 0x579   :  { %v3562_v8 = vmax.f32 %v3559_v59, 0.0 }
 0x57b   :  { %4063 = vmatmul.mubr.msk.f32.vlgmr.msra.gmra.mrb[18].mxu1 %vm83_vm1, %v3562_v8 }
 0x64e   :  { %v3653_v9 = vpop.f32.mrb[18].mxu1 }
 0x64f   :  { %v3654_v15 = vadd.f32 %v3791_v0, %v3653_v9  ;;  %v4064_v16 = vpop.f32.mrb[19].mxu1 }
 0x651   :  { %3658 = vst.msk [vmem:[#allocation11] sm:$0x3] %vm3657_vm11, %v3654_v15 }
 0x652   :  { %4758 = shalt.err (!%p4755_p0)
}
 0x653   :  { %s4759_s13 = scalar_lea.hbm %s5586_s12, 32 }
 0x654   :  { %p4760_p1 = scmp.ne.s32.totalorder %s5586_s12, %s4759_s13  ;;  %p4763_p2 = scmp.lt.u32.totalorder %s4759_s13, %s5586_s12 }
 0x656   :  { %p4765_p3 = pnand %p4763_p2, %p4760_p1 }
 0x658   :  { %4768 = shalt.err (!%p4765_p3)
}
 0x659   :  { %3668 = dma.vmem_to_hbm [thread:$0]  %s3666_s30, 32, %s5586_s12, [#allocation7]  }
 0x65a   :  { %4773 = dma.done.wait [#allocation7], 32  }
 0x65b   :  { %4774 = vsyncadd [#allocation7], 4294967264 }
 0x65c   :  { %3672 = vsyncpa [#allocation6], 1 }
 0x65d   :  { %3673 = vsyncpa [#allocation9], 1 }
 0x65e   :  { %3674 = vsyncpa [#allocation7], 1 }

</bundles_post_ra>
